<compile_context>
chip_gen: v5e
topology: v5e:2x2
jax: 0.10.0
libtpu: 0.0.40
codegen_flags: <defaults>
</compile_context>

<pallas_src>
import functools

import jax
import jax.numpy as jnp
from jax.experimental import pallas as pl
from jax.experimental.pallas import tpu as pltpu

HIDDEN = 768
NUM_CLASSES = 13
PADDED_CLASSES = 128      # lane-dense classifier width (unmasked vst)
NEG_INF = -1e30           # finite pad bias: exp() underflows to 0, no inf-inf NaN


def _tpu_generation():
    try:
        kind = jax.devices()[0].device_kind.lower()
    except Exception:
        return 0
    for g in (7, 6, 5, 4):
        if "v%d" % g in kind:
            return g
    return 0


_GEN = _tpu_generation()
_BIG_TILE = 256 if _GEN >= 6 else 128   # v6e/v7x MXU is 256-wide; v5e is 128
_BF16_TANH = _GEN >= 6                  # v6e/v7x have a bf16 EUP/VPU path


def oha_head_kernel(cls_ref, wp_ref, bp_ref, wc_ref, bc_ref, out_ref, *, bf16_act):
    # CLS hidden state arrives as f32 straight from the encoder-output view;
    # cast to bf16 in-register for the MXU.
    x = cls_ref[...].astype(jnp.bfloat16)                          # [tile_b, 768]

    # BERT pooler: tanh(x @ Wp + bp), f32 accumulation on the MXU.
    acc = jnp.dot(x, wp_ref[...], preferred_element_type=jnp.float32) + bp_ref[...]
    if bf16_act:
        pooled = jnp.tanh(acc.astype(jnp.bfloat16))    # bf16 tanh (v6e/v7x)
    else:
        pooled = jnp.tanh(acc).astype(jnp.bfloat16)    # f32 tanh (v5e), bf16 for MXU

    # Dropout(p=0.5) is identity at inference time.

    # Classifier: pooled @ Wc + bc. Output padded to 128 lanes; pad lanes carry a
    # NEG_INF bias (zero weight columns) so they vanish from the softmax.
    logits = (jnp.dot(pooled, wc_ref[...], preferred_element_type=jnp.float32)
              + bc_ref[...])                                       # [tile_b, 128] f32

    # Numerically stable LogSoftmax over the class axis.
    m = jnp.max(logits, axis=1, keepdims=True)
    shifted = logits - m
    lse = jnp.log(jnp.sum(jnp.exp(shifted), axis=1, keepdims=True))
    out_ref[...] = shifted - lse


def pack_oha_params(w_pool, b_pool, w_cls, b_cls):
    """One-time weight prep (transpose / bf16 cast / lane padding).

    Call once at model-load time, NOT per forward call: this removes a full
    f32 weight read + transposed bf16 write (~3.7 MiB HBM traffic) from the
    per-call path.
    """
    wp = jnp.asarray(w_pool, jnp.float32).T.astype(jnp.bfloat16)          # [768, 768]
    bp = jnp.asarray(b_pool, jnp.float32).reshape(1, HIDDEN)              # [1, 768]
    wc = jnp.pad(jnp.asarray(w_cls, jnp.float32).T.astype(jnp.bfloat16),
                 ((0, 0), (0, PADDED_CLASSES - NUM_CLASSES)))             # [768, 128]
    bc = jnp.pad(jnp.asarray(b_cls, jnp.float32).reshape(1, NUM_CLASSES),
                 ((0, 0), (0, PADDED_CLASSES - NUM_CLASSES)),
                 constant_values=NEG_INF)                                 # [1, 128]
    return wp, bp, wc, bc


def _pick_tile_b(batch):
    if batch >= 2 * _BIG_TILE:
        return _BIG_TILE                 # full MXU-height tiles
    if batch >= 32:
        # Split into >=2 tiles so both v7x TensorCores get work; round the tile
        # to 16 rows (bf16 LHS packs 16 rows per sublane group).
        half = -(-batch // 2)
        return -(-half // 16) * 16
    return batch                         # tiny batch: one full-extent tile


def oha_forward(hidden_states, packed_params):
    """OHAModel head forward.

    hidden_states: [B, S, HIDDEN] f32 -- final BERT encoder hidden states.
    packed_params: output of pack_oha_params (bf16 [in,out] weights, padded bias).
    Returns [B, NUM_CLASSES] f32 log-probabilities.
    """
    wp, bp, wc, bc = packed_params
    B, S, H = hidden_states.shape
    assert H == HIDDEN

    # Metadata-only view [B, S*HIDDEN]; the first-HIDDEN-columns block of each row
    # is exactly the CLS-token hidden state, so the kernel's BlockSpec performs the
    # CLS gather for free (768 % 128 == 0 keeps the (8,128) block rule satisfied).
    hs2d = hidden_states.reshape(B, S * H)

    tile_b = _pick_tile_b(B)
    grid = (pl.cdiv(B, tile_b),)

    cost = pl.CostEstimate(
        flops=2 * B * HIDDEN * (HIDDEN + PADDED_CLASSES),
        transcendentals=B * (HIDDEN + PADDED_CLASSES),
        bytes_accessed=(wp.size * 2 + wc.size * 2 + bp.size * 4 + bc.size * 4
                        + B * HIDDEN * 4 + B * PADDED_CLASSES * 4),
    )

    out = pl.pallas_call(
        functools.partial(oha_head_kernel, bf16_act=_BF16_TANH),
        out_shape=jax.ShapeDtypeStruct((B, PADDED_CLASSES), jnp.float32),
        grid=grid,
        in_specs=[
            pl.BlockSpec((tile_b, HIDDEN), lambda i: (i, 0)),          # CLS rows
            pl.BlockSpec((HIDDEN, HIDDEN), lambda i: (0, 0)),          # Wp (VMEM-resident)
            pl.BlockSpec((1, HIDDEN), lambda i: (0, 0)),               # bp
            pl.BlockSpec((HIDDEN, PADDED_CLASSES), lambda i: (0, 0)),  # Wc
            pl.BlockSpec((1, PADDED_CLASSES), lambda i: (0, 0)),       # bc
        ],
        out_specs=pl.BlockSpec((tile_b, PADDED_CLASSES), lambda i: (i, 0)),
        compiler_params=pltpu.CompilerParams(
            # Batch tiles are independent -> shard across TensorCores on v7x.
            dimension_semantics=("parallel",),
        ),
        cost_estimate=cost,
    )(hs2d, wp, bp, wc, bc)

    # TODO(synk): if the downstream consumer tolerates the padded [B, 128] slab,
    #             return `out` directly and skip this slice.
    return out[:, :NUM_CLASSES]


if __name__ == "__main__":
    key = jax.random.PRNGKey(0)
    k_h, k_wp, k_bp, k_wc, k_bc = jax.random.split(key, 5)

    B, S = 8, 8  # small demo shapes; HIDDEN is fixed at 768 by the module

    # TODO(synk): the 12-layer pretrained BERT encoder (self.bert) is out of scope
    #             (no checkpoint); its final hidden states are modeled by a
    #             deterministic random tensor.
    hidden_states = jax.random.normal(k_h, (B, S, HIDDEN), dtype=jnp.float32)

    # Synthetic parameters in PyTorch nn.Linear layout ([out, in] weights, 1-D biases).
    w_pool = jax.random.normal(k_wp, (HIDDEN, HIDDEN), dtype=jnp.float32) * 0.02
    b_pool = jax.random.normal(k_bp, (HIDDEN,), dtype=jnp.float32) * 0.02
    w_cls = jax.random.normal(k_wc, (NUM_CLASSES, HIDDEN), dtype=jnp.float32) * 0.02
    b_cls = jax.random.normal(k_bc, (NUM_CLASSES,), dtype=jnp.float32) * 0.02

    # One-time weight packing, hoisted out of the per-call path.
    packed = jax.block_until_ready(pack_oha_params(w_pool, b_pool, w_cls, b_cls))

    forward = jax.jit(oha_forward)
    out = jax.block_until_ready(forward(hidden_states, packed))
    assert out.shape == (B, NUM_CLASSES)

    # Sanity 1: log-softmax rows exponentiate/sum to 1.
    row_sums = jnp.exp(out).sum(axis=1)
    assert bool(jnp.all(jnp.abs(row_sums - 1.0) < 1e-3))

    # Sanity 2: matches a pure-JAX reference at matched (bf16-weight) precision.
    cls_ref = hidden_states[:, 0, :].astype(jnp.bfloat16)
    pooled_ref = jnp.tanh(
        jnp.dot(cls_ref, w_pool.T.astype(jnp.bfloat16),
                preferred_element_type=jnp.float32) + b_pool[None, :]
    )
    logits_ref = jnp.dot(pooled_ref.astype(jnp.bfloat16),
                         w_cls.T.astype(jnp.bfloat16),
                         preferred_element_type=jnp.float32) + b_cls[None, :]
    ref = jax.nn.log_softmax(logits_ref, axis=1)
    assert bool(jnp.max(jnp.abs(out - ref)) < 2e-2)

    print("KERNEL_OK")
</pallas_src>

<mosaic_0001>
module attributes {stable_mosaic.version = 11 : i64} {
  func.func @oha_head_kernel(%arg0: i32, %arg1: memref<8x768xf32, #tpu.memory_space<vmem>>, %arg2: memref<768x768xbf16, #tpu.memory_space<vmem>>, %arg3: memref<1x768xf32, #tpu.memory_space<vmem>>, %arg4: memref<768x128xbf16, #tpu.memory_space<vmem>>, %arg5: memref<1x128xf32, #tpu.memory_space<vmem>>, %arg6: memref<8x128xf32, #tpu.memory_space<vmem>>) attributes {dimension_semantics = [#tpu.dimension_semantics<parallel>], iteration_bounds = array<i64: 1>, scalar_prefetch = 0 : i64, scratch_operands = 0 : i64, tpu.core_type = #tpu.core_type<tc>, window_params = [{transform_indices = @transform_0, window_bounds = array<i64: 8, 768>}, {pipeline_mode = #tpu.pipeline_mode<synchronous>, transform_indices = @transform_1, window_bounds = array<i64: 768, 768>}, {pipeline_mode = #tpu.pipeline_mode<synchronous>, transform_indices = @transform_2, window_bounds = array<i64: 1, 768>}, {pipeline_mode = #tpu.pipeline_mode<synchronous>, transform_indices = @transform_3, window_bounds = array<i64: 768, 128>}, {pipeline_mode = #tpu.pipeline_mode<synchronous>, transform_indices = @transform_4, window_bounds = array<i64: 1, 128>}, {transform_indices = @transform_5, window_bounds = array<i64: 8, 128>}]} {
    %c0 = arith.constant 0 : index
    %c0_0 = arith.constant 0 : index
    %0 = vector.load %arg1[%c0, %c0_0] : memref<8x768xf32, #tpu.memory_space<vmem>>, vector<8x768xf32>
    %1 = arith.truncf %0 : vector<8x768xf32> to vector<8x768xbf16>
    %c0_1 = arith.constant 0 : index
    %c0_2 = arith.constant 0 : index
    %2 = vector.load %arg2[%c0_1, %c0_2] : memref<768x768xbf16, #tpu.memory_space<vmem>>, vector<768x768xbf16>
    %cst = arith.constant dense<0.000000e+00> : vector<8x768xf32>
    %3 = tpu.matmul %1, %2, %cst {dimension_numbers = #tpu.dot_dimension_numbers<[1], [0], [0], [1], [0, 0, 1, 1], [], []>} : vector<8x768xbf16>, vector<768x768xbf16>, vector<8x768xf32> -> vector<8x768xf32>
    %c0_3 = arith.constant 0 : index
    %c0_4 = arith.constant 0 : index
    %4 = vector.load %arg3[%c0_3, %c0_4] : memref<1x768xf32, #tpu.memory_space<vmem>>, vector<1x768xf32>
    %5 = vector.broadcast %4 : vector<1x768xf32> to vector<8x768xf32>
    %6 = arith.addf %3, %5 : vector<8x768xf32>
    %7 = math.tanh %6 : vector<8x768xf32>
    %8 = arith.truncf %7 : vector<8x768xf32> to vector<8x768xbf16>
    %c0_5 = arith.constant 0 : index
    %c0_6 = arith.constant 0 : index
    %9 = vector.load %arg4[%c0_5, %c0_6] : memref<768x128xbf16, #tpu.memory_space<vmem>>, vector<768x128xbf16>
    %cst_7 = arith.constant dense<0.000000e+00> : vector<8x128xf32>
    %10 = tpu.matmul %8, %9, %cst_7 {dimension_numbers = #tpu.dot_dimension_numbers<[1], [0], [0], [1], [0, 0, 1, 1], [], []>} : vector<8x768xbf16>, vector<768x128xbf16>, vector<8x128xf32> -> vector<8x128xf32>
    %c0_8 = arith.constant 0 : index
    %c0_9 = arith.constant 0 : index
    %11 = vector.load %arg5[%c0_8, %c0_9] : memref<1x128xf32, #tpu.memory_space<vmem>>, vector<1x128xf32>
    %12 = vector.broadcast %11 : vector<1x128xf32> to vector<8x128xf32>
    %13 = arith.addf %10, %12 : vector<8x128xf32>
    %cst_10 = arith.constant dense<0xFF800000> : vector<8xf32>
    %14 = vector.multi_reduction <maximumf>, %13, %cst_10 [1] : vector<8x128xf32> to vector<8xf32>
    %15 = vector.shape_cast %14 : vector<8xf32> to vector<8x1xf32>
    %16 = vector.broadcast %15 : vector<8x1xf32> to vector<8x128xf32>
    %17 = arith.subf %13, %16 : vector<8x128xf32>
    %18 = math.exp %17 : vector<8x128xf32>
    %cst_11 = arith.constant dense<0.000000e+00> : vector<8xf32>
    %19 = vector.multi_reduction <add>, %18, %cst_11 [1] : vector<8x128xf32> to vector<8xf32>
    %20 = vector.shape_cast %19 : vector<8xf32> to vector<8x1xf32>
    %21 = math.log %20 : vector<8x1xf32>
    %22 = vector.broadcast %21 : vector<8x1xf32> to vector<8x128xf32>
    %23 = arith.subf %17, %22 : vector<8x128xf32>
    %c0_12 = arith.constant 0 : index
    %c0_13 = arith.constant 0 : index
    %24 = vector.load %arg6[%c0_12, %c0_13] : memref<8x128xf32, #tpu.memory_space<vmem>>, vector<8x128xf32>
    tpu.vector_store %arg6[%c0_12, %c0_13], %23 {strides = array<i32>} : memref<8x128xf32, #tpu.memory_space<vmem>>, vector<8x128xf32>,
    return
  }
  func.func @transform_0(%arg0: i32) -> (i32, i32) {
    %c0_i32 = arith.constant 0 : i32
    %c0_i32_0 = arith.constant 0 : i32
    return %arg0, %c0_i32 : i32, i32
  }
  func.func @transform_1(%arg0: i32) -> (i32, i32) {
    %c0_i32 = arith.constant 0 : i32
    %c0_i32_0 = arith.constant 0 : i32
    %c0_i32_1 = arith.constant 0 : i32
    return %c0_i32, %c0_i32_0 : i32, i32
  }
  func.func @transform_2(%arg0: i32) -> (i32, i32) {
    %c0_i32 = arith.constant 0 : i32
    %c0_i32_0 = arith.constant 0 : i32
    %c0_i32_1 = arith.constant 0 : i32
    return %c0_i32, %c0_i32_0 : i32, i32
  }
  func.func @transform_3(%arg0: i32) -> (i32, i32) {
    %c0_i32 = arith.constant 0 : i32
    %c0_i32_0 = arith.constant 0 : i32
    %c0_i32_1 = arith.constant 0 : i32
    return %c0_i32, %c0_i32_0 : i32, i32
  }
  func.func @transform_4(%arg0: i32) -> (i32, i32) {
    %c0_i32 = arith.constant 0 : i32
    %c0_i32_0 = arith.constant 0 : i32
    %c0_i32_1 = arith.constant 0 : i32
    return %c0_i32, %c0_i32_0 : i32, i32
  }
  func.func @transform_5(%arg0: i32) -> (i32, i32) {
    %c0_i32 = arith.constant 0 : i32
    %c0_i32_0 = arith.constant 0 : i32
    return %arg0, %c0_i32 : i32, i32
  }
}

</mosaic_0001>

<bundles_post_ra>
// kernel: oha_forward.1
= control target key start
LH: loop header
LB: loop body
LE: loop exit
PB: predicated region body
PF: predicated region fallthrough
CT: control target
= control target key end

     0   :  { %10 = vsyncpa [#allocation3], 0  ;;  %s4799_s0 = inlined_call_operand.vmem [shape: f32[8,6144], index: 0, kind: input, shape index: {}]   ;;  %s4800_s1 = inlined_call_operand.hbm [shape: bf16[768,768], index: 1, kind: input, shape index: {}]   ;;  %s4801_s2 = inlined_call_operand.hbm [shape: f32[1,768], index: 2, kind: input, shape index: {}]   ;;  %s4802_s3 = inlined_call_operand.hbm [shape: bf16[768,128], index: 3, kind: input, shape index: {}]   ;;  %s4803_s4 = inlined_call_operand.hbm [shape: f32[1,128], index: 4, kind: input, shape index: {}]   ;;  %s4804_s5 = inlined_call_operand.hbm [shape: f32[8,128], index: 5, kind: output, shape index: {}]  }
   0x1   :  { %11 = vsyncpa [#allocation6], 0 }
   0x2   :  { %12 = vsyncpa [#allocation9], 0  ;;  %s34_s20 = sshll.u32 %s4801_s2, 4  ;;  %s35_s20 = int_to_ptr.hbm [resolvable:$true] %s34_s20 }
   0x3   :  { %13 = vsyncpa [#allocation4], 0  ;;  %s4645_s21 = smov [#allocation5]   ;;  %s20_s25 = sshll.u32 %s4800_s1, 4  ;;  %s21_s25 = int_to_ptr.hbm [resolvable:$true] %s20_s25 }
   0x4   :  { %s36_s22 = sshll.u32 %s4645_s21, 4  ;;  %s4646_s26 = smov [#allocation2]   ;;  %s37_s22 = int_to_ptr.vmem [resolvable:$true] %s36_s22 }
   0x5   :  { %39 = dma.hbm_to_vmem [thread:$0]  %s35_s20, 96, %s37_s22, [#allocation6]  }
   0x6   :  { %s22_s27 = sshll.u32 %s4646_s26, 4  ;;  %s4647_s28 = smov 384   ;;  %s23_s27 = int_to_ptr.vmem [resolvable:$true] %s22_s27 }
   0x7   :  { %s4648_s29 = smov 24   ;;  %s44_s2 = sshll.u32 %s4802_s3, 4  ;;  %s45_s2 = int_to_ptr.hbm [resolvable:$true] %s44_s2 }
   0x8   :  { %28 = dma.hbm_to_vmem [thread:$0]  %s21_s25, 36864, %s23_s27, [#allocation3], %s4647_s28, %s4647_s28, %s4648_s29  }
   0x9   :  { %s4649_s7 = smov [#allocation7]   ;;  %s58_s1 = sshll.u32 %s4803_s4, 4  ;;  %s59_s1 = int_to_ptr.hbm [resolvable:$true] %s58_s1 }
   0xa   :  { %s46_s8 = sshll.u32 %s4649_s7, 4  ;;  %s4650_s11 = smov 64   ;;  %s47_s8 = int_to_ptr.vmem [resolvable:$true] %s46_s8 }
   0xb   :  { %s4651_s12 = smov 4   ;;  %s4652_s13 = smov [#allocation8]  }
   0xc   :  { %52 = dma.hbm_to_vmem [thread:$0]  %s45_s2, 6144, %s47_s8, [#allocation6], %s4650_s11, %s4650_s11, %s4651_s12  }
   0xd   :  { %s60_s14 = sshll.u32 %s4652_s13, 4  ;;  %s61_s14 = int_to_ptr.vmem [resolvable:$true] %s60_s14 }
   0xe   :  { %63 = dma.hbm_to_vmem [thread:$0]  %s59_s1, 16, %s61_s14, [#allocation9]  }
   0xf   :  { %4637 = dma.done.wait [#allocation3], 36864  }
  0x10   :  { %4638 = vsyncadd [#allocation3], 4294930432 }
  0x11   :  { %4639 = dma.done.wait [#allocation6], 6240  }
  0x12   :  { %4640 = vsyncadd [#allocation6], 4294961056 }
  0x13   :  { %4641 = dma.done.wait [#allocation9], 16  }
  0x14   :  { %4642 = vsyncadd [#allocation9], 4294967280  ;;  %v2980_v0 = vld [vmem:[#allocation2 + $0x150] sm:$0xf]  ;;  %v4199_v1 = vld [vmem:[#allocation2 + $0x164] sm:$0xf0] }
  0x15   :  { %v3172_v2 = vld [vmem:[#allocation2 + $0x2d0] sm:$0xf]  ;;  %v2981_v3 = vor.u32 %v4199_v1, %v2980_v0  ;;  %v4247_v4 = vld [vmem:[#allocation2 + $0x2e4] sm:$0xf0]  ;;  %v2956_v11 = vld [vmem:[#allocation2 + $0x120] sm:$0xf] }
  0x16   :  { %v3364_v5 = vld [vmem:[#allocation2 + $0x450] sm:$0xf]  ;;  %v4295_v6 = vld [vmem:[#allocation2 + $0x464] sm:$0xf0]  ;;  %v3173_v7 = vor.u32 %v4247_v4, %v3172_v2  ;;  %v4193_v13 = vld [vmem:[#allocation2 + $0x134] sm:$0xf0] }
  0x17   :  { %v3365_v8 = vor.u32 %v4295_v6, %v3364_v5  ;;  %v3556_v9 = vld [vmem:[#allocation2 + $0x5d0] sm:$0xf]  ;;  %v4343_v10 = vld [vmem:[#allocation2 + $0x5e4] sm:$0xf0]  ;;  %1834 = vmatpush.bf16.msra.mxu0 %v2981_v3  ;;  %v3148_v14 = vld [vmem:[#allocation2 + $0x2a0] sm:$0xf]  ;;  %v2957_v16 = vor.u32 %v4193_v13, %v2956_v11 }
  0x18   :  { %v3557_v12 = vor.u32 %v4343_v10, %v3556_v9  ;;  %v4241_v15 = vld [vmem:[#allocation2 + $0x2b4] sm:$0xf0]  ;;  %1847 = vmatpush.bf16.msra.mxu1 %v3173_v7  ;;  %v3340_v18 = vld [vmem:[#allocation2 + $0x420] sm:$0xf]  ;;  %v2932_v23 = vld [vmem:[#allocation2 + $0xf0] sm:$0xf] }
  0x19   :  { %1860 = vmatpush.bf16.msra.mxu2 %v3365_v8  ;;  %v3149_v17 = vor.u32 %v4241_v15, %v3148_v14  ;;  %v4289_v19 = vld [vmem:[#allocation2 + $0x434] sm:$0xf0]  ;;  %v3532_v20 = vld [vmem:[#allocation2 + $0x5a0] sm:$0xf]  ;;  %v4187_v24 = vld [vmem:[#allocation2 + $0x104] sm:$0xf0] }
  0x1a   :  { %1873 = vmatpush.bf16.msra.mxu3 %v3557_v12  ;;  %v3341_v21 = vor.u32 %v4289_v19, %v3340_v18  ;;  %v4337_v22 = vld [vmem:[#allocation2 + $0x5b4] sm:$0xf0]  ;;  %v3124_v26 = vld [vmem:[#allocation2 + $0x270] sm:$0xf]  ;;  %v4235_v27 = vld [vmem:[#allocation2 + $0x284] sm:$0xf0]  ;;  %v2933_v29 = vor.u32 %v4187_v24, %v2932_v23 }
  0x1b   :  { %v3533_v25 = vor.u32 %v4337_v22, %v3532_v20  ;;  %v3316_v28 = vld [vmem:[#allocation2 + $0x3f0] sm:$0xf]  ;;  %1835 = vmatpush.bf16.msra.mxu0 %v2957_v16  ;;  %v4283_v30 = vld [vmem:[#allocation2 + $0x404] sm:$0xf0]  ;;  %v3125_v33 = vor.u32 %v4235_v27, %v3124_v26  ;;  %v2908_v35 = vld [vmem:[#allocation2 + $0xc0] sm:$0xf] }
  0x1c   :  { %v3508_v31 = vld [vmem:[#allocation2 + $0x570] sm:$0xf]  ;;  %v4331_v32 = vld [vmem:[#allocation2 + $0x584] sm:$0xf0]  ;;  %1848 = vmatpush.bf16.msra.mxu1 %v3149_v17  ;;  %v3317_v34 = vor.u32 %v4283_v30, %v3316_v28  ;;  %v4181_v36 = vld [vmem:[#allocation2 + $0xd4] sm:$0xf0] }
  0x1d   :  { %1861 = vmatpush.bf16.msra.mxu2 %v3341_v21  ;;  %v3100_v37 = vld [vmem:[#allocation2 + $0x240] sm:$0xf]  ;;  %v3509_v38 = vor.u32 %v4331_v32, %v3508_v31  ;;  %v4229_v39 = vld [vmem:[#allocation2 + $0x254] sm:$0xf0]  ;;  %v2909_v44 = vor.u32 %v4181_v36, %v2908_v35  ;;  %v2884_v47 = vld [vmem:[#allocation2 + $0x90] sm:$0xf] }
  0x1e   :  { %1874 = vmatpush.bf16.msra.mxu3 %v3533_v25  ;;  %v3292_v40 = vld [vmem:[#allocation2 + $0x3c0] sm:$0xf]  ;;  %v4277_v41 = vld [vmem:[#allocation2 + $0x3d4] sm:$0xf0]  ;;  %v3101_v45 = vor.u32 %v4229_v39, %v3100_v37  ;;  %v4175_v48 = vld [vmem:[#allocation2 + $0xa4] sm:$0xf0] }
  0x1f   :  { %v3484_v42 = vld [vmem:[#allocation2 + $0x540] sm:$0xf]  ;;  %v4325_v43 = vld [vmem:[#allocation2 + $0x554] sm:$0xf0]  ;;  %1836 = vmatpush.bf16.msra.mxu0 %v2933_v29  ;;  %v3293_v46 = vor.u32 %v4277_v41, %v3292_v40  ;;  %v3076_v49 = vld [vmem:[#allocation2 + $0x210] sm:$0xf]  ;;  %v2885_v56 = vor.u32 %v4175_v48, %v2884_v47 }
  0x20   :  { %1849 = vmatpush.bf16.msra.mxu1 %v3125_v33  ;;  %v3485_v50 = vor.u32 %v4325_v43, %v3484_v42  ;;  %v4223_v51 = vld [vmem:[#allocation2 + $0x224] sm:$0xf0]  ;;  %v3268_v52 = vld [vmem:[#allocation2 + $0x390] sm:$0xf]  ;;  %v2860_v59 = vld [vmem:[#allocation2 + $0x60] sm:$0xf] }
  0x21   :  { %1862 = vmatpush.bf16.msra.mxu2 %v3317_v34  ;;  %v4271_v53 = vld [vmem:[#allocation2 + $0x3a4] sm:$0xf0]  ;;  %v3460_v54 = vld [vmem:[#allocation2 + $0x510] sm:$0xf]  ;;  %v3077_v57 = vor.u32 %v4223_v51, %v3076_v49  ;;  %v4169_v60 = vld [vmem:[#allocation2 + $0x74] sm:$0xf0] }
  0x22   :  { %1875 = vmatpush.bf16.msra.mxu3 %v3509_v38  ;;  %v4319_v55 = vld [vmem:[#allocation2 + $0x524] sm:$0xf0]  ;;  %v3269_v58 = vor.u32 %v4271_v53, %v3268_v52  ;;  %v3052_v61 = vld [vmem:[#allocation2 + $0x1e0] sm:$0xf]  ;;  %v4217_v63 = vld [vmem:[#allocation2 + $0x1f4] sm:$0xf0]  ;;  %v2861_v4 = vor.u32 %v4169_v60, %v2860_v59 }
  0x23   :  { %1837 = vmatpush.bf16.msra.mxu0 %v2909_v44  ;;  %v3461_v62 = vor.u32 %v4319_v55, %v3460_v54  ;;  %v3244_v0 = vld [vmem:[#allocation2 + $0x360] sm:$0xf]  ;;  %v4265_v1 = vld [vmem:[#allocation2 + $0x374] sm:$0xf0]  ;;  %v3053_v5 = vor.u32 %v4217_v63, %v3052_v61  ;;  %v2836_v7 = vld [vmem:[#allocation2 + $0x30] sm:$0xf] }
  0x24   :  { %1850 = vmatpush.bf16.msra.mxu1 %v3101_v45  ;;  %v3436_v2 = vld [vmem:[#allocation2 + $0x4e0] sm:$0xf]  ;;  %v4313_v3 = vld [vmem:[#allocation2 + $0x4f4] sm:$0xf0]  ;;  %v3245_v6 = vor.u32 %v4265_v1, %v3244_v0  ;;  %v4163_v8 = vld [vmem:[#allocation2 + $0x44] sm:$0xf0] }
  0x25   :  { %1863 = vmatpush.bf16.msra.mxu2 %v3293_v46  ;;  %v3028_v9 = vld [vmem:[#allocation2 + $0x1b0] sm:$0xf]  ;;  %v3437_v10 = vor.u32 %v4313_v3, %v3436_v2  ;;  %v4211_v11 = vld [vmem:[#allocation2 + $0x1c4] sm:$0xf0]  ;;  %v2837_v16 = vor.u32 %v4163_v8, %v2836_v7  ;;  %v2812_v17 = vld [vmem:[#allocation2] sm:$0xf] }
  0x26   :  { %1876 = vmatpush.bf16.msra.mxu3 %v3485_v50  ;;  %v3220_v12 = vld [vmem:[#allocation2 + $0x330] sm:$0xf]  ;;  %v4259_v13 = vld [vmem:[#allocation2 + $0x344] sm:$0xf0]  ;;  %v4157_v18 = vld [vmem:[#allocation2 + $0x14] sm:$0xf0]  ;;  %v3029_v19 = vor.u32 %v4211_v11, %v3028_v9 }
  0x27   :  { %1838 = vmatpush.bf16.msra.mxu0 %v2885_v56  ;;  %v3412_v14 = vld [vmem:[#allocation2 + $0x4b0] sm:$0xf]  ;;  %v4307_v15 = vld [vmem:[#allocation2 + $0x4c4] sm:$0xf0]  ;;  %v3221_v20 = vor.u32 %v4259_v13, %v3220_v12  ;;  %v3004_v21 = vld [vmem:[#allocation2 + $0x180] sm:$0xf]  ;;  %v2813_v31 = vor.u32 %v4157_v18, %v2812_v17 }
  0x28   :  { %1851 = vmatpush.bf16.msra.mxu1 %v3077_v57  ;;  %v4205_v22 = vld [vmem:[#allocation2 + $0x194] sm:$0xf0]  ;;  %v3196_v23 = vld [vmem:[#allocation2 + $0x300] sm:$0xf]  ;;  %v3413_v24 = vor.u32 %v4307_v15, %v3412_v14  ;;  %v3748_v28 = vld [vmem:[#allocation2 + $0x750] sm:$0xf] }
  0x29   :  { %1864 = vmatpush.bf16.msra.mxu2 %v3269_v58  ;;  %v4253_v25 = vld [vmem:[#allocation2 + $0x314] sm:$0xf0]  ;;  %v3388_v26 = vld [vmem:[#allocation2 + $0x480] sm:$0xf]  ;;  %v4391_v29 = vld [vmem:[#allocation2 + $0x764] sm:$0xf0]  ;;  %v3005_v35 = vor.u32 %v4205_v22, %v3004_v21 }
  0x2a   :  { %1877 = vmatpush.bf16.msra.mxu3 %v3461_v62  ;;  %v4301_v27 = vld [vmem:[#allocation2 + $0x494] sm:$0xf0]  ;;  %v3940_v30 = vld [vmem:[#allocation2 + $0x8d0] sm:$0xf]  ;;  %v4439_v32 = vld [vmem:[#allocation2 + $0x8e4] sm:$0xf0]  ;;  %v3197_v36 = vor.u32 %v4253_v25, %v3196_v23  ;;  %v3749_v40 = vor.u32 %v4391_v29, %v3748_v28 }
  0x2b   :  { %1839 = vmatpush.bf16.msra.mxu0 %v2861_v4  ;;  %v4196_v33 = vld [vmem:[#allocation2 + $0x154] sm:$0xf]  ;;  %v2982_v34 = vld [vmem:[#allocation2 + $0x168] sm:$0xf0]  ;;  %v3389_v39 = vor.u32 %v4301_v27, %v3388_v26  ;;  %v3941_v41 = vor.u32 %v4439_v32, %v3940_v30  ;;  %v3724_v43 = vld [vmem:[#allocation2 + $0x720] sm:$0xf] }
  0x2c   :  { %1852 = vmatpush.bf16.msra.mxu1 %v3053_v5  ;;  %v4244_v37 = vld [vmem:[#allocation2 + $0x2d4] sm:$0xf]  ;;  %v3174_v38 = vld [vmem:[#allocation2 + $0x2e8] sm:$0xf0]  ;;  %v2985_v42 = vor.u32 %v4196_v33, %v2982_v34  ;;  %v4385_v44 = vld [vmem:[#allocation2 + $0x734] sm:$0xf0] }
  0x2d   :  { %1865 = vmatpush.bf16.msra.mxu2 %v3245_v6  ;;  %v3916_v45 = vld [vmem:[#allocation2 + $0x8a0] sm:$0xf]  ;;  %v3177_v46 = vor.u32 %v4244_v37, %v3174_v38  ;;  %v4433_v47 = vld [vmem:[#allocation2 + $0x8b4] sm:$0xf0]  ;;  %v4190_v48 = vld [vmem:[#allocation2 + $0x124] sm:$0xf]  ;;  %v3725_v52 = vor.u32 %v4385_v44, %v3724_v43 }
  0x2e   :  { %1878 = vmatpush.bf16.msra.mxu3 %v3437_v10  ;;  %v2958_v49 = vld [vmem:[#allocation2 + $0x138] sm:$0xf0]  ;;  %v4238_v50 = vld [vmem:[#allocation2 + $0x2a4] sm:$0xf]  ;;  %v3700_v53 = vld [vmem:[#allocation2 + $0x6f0] sm:$0xf]  ;;  %v3917_v54 = vor.u32 %v4433_v47, %v3916_v45 }
  0x2f   :  { %1840 = vmatpush.bf16.msra.mxu0 %v2837_v16  ;;  %v3150_v51 = vld [vmem:[#allocation2 + $0x2b8] sm:$0xf0]  ;;  %v2961_v55 = vor.u32 %v4190_v48, %v2958_v49  ;;  %v4379_v56 = vld [vmem:[#allocation2 + $0x704] sm:$0xf0]  ;;  %v3892_v57 = vld [vmem:[#allocation2 + $0x870] sm:$0xf] }
  0x30   :  { %1853 = vmatpush.bf16.msra.mxu1 %v3029_v19  ;;  %v4427_v58 = vld [vmem:[#allocation2 + $0x884] sm:$0xf0]  ;;  %v3153_v59 = vor.u32 %v4238_v50, %v3150_v51  ;;  %v4184_v60 = vld [vmem:[#allocation2 + $0xf4] sm:$0xf]  ;;  %v2934_v61 = vld [vmem:[#allocation2 + $0x108] sm:$0xf0]  ;;  %v3701_v0 = vor.u32 %v4379_v56, %v3700_v53 }
  0x31   :  { %1866 = vmatpush.bf16.msra.mxu2 %v3221_v20  ;;  %v4232_v62 = vld [vmem:[#allocation2 + $0x274] sm:$0xf]  ;;  %v3126_v63 = vld [vmem:[#allocation2 + $0x288] sm:$0xf0]  ;;  %v3893_v1 = vor.u32 %v4427_v58, %v3892_v57  ;;  %v3676_v2 = vld [vmem:[#allocation2 + $0x6c0] sm:$0xf]  ;;  %v2937_v5 = vor.u32 %v4184_v60, %v2934_v61 }
  0x32   :  { %1879 = vmatpush.bf16.msra.mxu3 %v3413_v24  ;;  %v82_v3 = vld [vmem:[%s4799_s0 + $0x10] sm:$0xff]  ;;  %v80_v4 = vld [vmem:[%s4799_s0] sm:$0xff]  ;;  %v4373_v6 = vld [vmem:[#allocation2 + $0x6d4] sm:$0xf0]  ;;  %v3129_v11 = vor.u32 %v4232_v62, %v3126_v63  ;;  %s2798_s28 = sshll.u32 %s4804_s5, 4  ;;  %s2799_s28 = int_to_ptr.hbm [resolvable:$true] %s2798_s28 }
  0x33   :  { %1841 = vmatpush.bf16.msra.mxu0 %v2813_v31  ;;  %v3868_v7 = vld [vmem:[#allocation2 + $0x840] sm:$0xf]  ;;  %v4702_v8 = vpack.c.bf16 %v82_v3, %v82_v3  ;;  %v4704_v9 = vpack.c.bf16 %v80_v4, %v80_v4  ;;  %v83_v10 = vld [vmem:[%s4799_s0 + $0x18] sm:$0xff]  ;;  %v4178_v13 = vld [vmem:[#allocation2 + $0xc4] sm:$0xf]  ;;  %v3677_v18 = vor.u32 %v4373_v6, %v3676_v2 }
  0x34   :  { %1854 = vmatpush.bf16.msra.mxu1 %v3005_v35  ;;  %v4421_v12 = vld [vmem:[#allocation2 + $0x854] sm:$0xf0]  ;;  %v2910_v14 = vld [vmem:[#allocation2 + $0xd8] sm:$0xf0]  ;;  %v4709_v15 = vpack.c.bf16 %v83_v10, %v83_v10  ;;  %v4226_v16 = vld [vmem:[#allocation2 + $0x244] sm:$0xf] }
  0x35   :  { %1867 = vmatpush.bf16.msra.mxu2 %v3197_v36  ;;  %v3102_v17 = vld [vmem:[#allocation2 + $0x258] sm:$0xf0]  ;;  %v81_v19 = vld [vmem:[%s4799_s0 + $0x8] sm:$0xff]  ;;  %v3869_v20 = vor.u32 %v4421_v12, %v3868_v7  ;;  %v2913_v21 = vor.u32 %v4178_v13, %v2910_v14  ;;  %v3652_v22 = vld [vmem:[#allocation2 + $0x690] sm:$0xf] }
  0x36   :  { %1880 = vmatpush.bf16.msra.mxu3 %v3389_v39  ;;  %1842 = vmatmul.bf16.vlgmr.msra.gmra.mxu0 %v4704_v9  ;;  %v4367_v23 = vld [vmem:[#allocation2 + $0x6a4] sm:$0xf0]  ;;  %v3844_v24 = vld [vmem:[#allocation2 + $0x810] sm:$0xf]  ;;  %v4717_v25 = vpack.c.bf16 %v81_v19, %v81_v19  ;;  %v3105_v26 = vor.u32 %v4226_v16, %v3102_v17  ;;  %v4172_v28 = vld [vmem:[#allocation2 + $0x94] sm:$0xf] }
  0x37   :  { %1886 = vmatpush.bf16.msrb.mxu0 %v3749_v40  ;;  %v4415_v27 = vld [vmem:[#allocation2 + $0x824] sm:$0xf0]  ;;  %v2886_v29 = vld [vmem:[#allocation2 + $0xa8] sm:$0xf0]  ;;  %v4220_v30 = vld [vmem:[#allocation2 + $0x214] sm:$0xf]  ;;  %v3653_v32 = vor.u32 %v4367_v23, %v3652_v22 }
  0x38   :  { %1899 = vmatpush.bf16.msrb.mxu1 %v3941_v41  ;;  %1868 = vmatmul.bf16.vlgmr.msra.gmra.mxu2 %v4702_v8  ;;  %v3078_v31 = vld [vmem:[#allocation2 + $0x228] sm:$0xf0]  ;;  %v3845_v33 = vor.u32 %v4415_v27, %v3844_v24  ;;  %v2889_v34 = vor.u32 %v4172_v28, %v2886_v29  ;;  %v3628_v35 = vld [vmem:[#allocation2 + $0x660] sm:$0xf]  ;;  %v4361_v36 = vld [vmem:[#allocation2 + $0x674] sm:$0xf0] }
  0x39   :  { %1912 = vmatpush.bf16.msrb.mxu2 %v2985_v42  ;;  %1881 = vmatmul.bf16.vlgmr.msra.gmra.mxu3 %v4709_v15  ;;  %v3820_v37 = vld [vmem:[#allocation2 + $0x7e0] sm:$0xf]  ;;  %v3081_v38 = vor.u32 %v4220_v30, %v3078_v31  ;;  %v4409_v39 = vld [vmem:[#allocation2 + $0x7f4] sm:$0xf0]  ;;  %v4166_v40 = vld [vmem:[#allocation2 + $0x64] sm:$0xf]  ;;  %v3629_v44 = vor.u32 %v4361_v36, %v3628_v35 }
  0x3a   :  { %1925 = vmatpush.bf16.msrb.mxu3 %v3177_v46  ;;  %1855 = vmatmul.bf16.vlgmr.msra.gmra.mxu1 %v4717_v25  ;;  %v2862_v41 = vld [vmem:[#allocation2 + $0x78] sm:$0xf0]  ;;  %v4214_v42 = vld [vmem:[#allocation2 + $0x1e4] sm:$0xf]  ;;  %v3821_v45 = vor.u32 %v4409_v39, %v3820_v37  ;;  %v3604_v47 = vld [vmem:[#allocation2 + $0x630] sm:$0xf] }
  0x3b   :  { %1887 = vmatpush.bf16.msrb.mxu0 %v3725_v52  ;;  %v3054_v43 = vld [vmem:[#allocation2 + $0x1f8] sm:$0xf0]  ;;  %v2865_v46 = vor.u32 %v4166_v40, %v2862_v41  ;;  %v4355_v48 = vld [vmem:[#allocation2 + $0x644] sm:$0xf0]  ;;  %v3796_v49 = vld [vmem:[#allocation2 + $0x7b0] sm:$0xf] }
  0x3c   :  { %1900 = vmatpush.bf16.msrb.mxu1 %v3917_v54  ;;  %v3057_v50 = vor.u32 %v4214_v42, %v3054_v43  ;;  %v4403_v51 = vld [vmem:[#allocation2 + $0x7c4] sm:$0xf0]  ;;  %v4160_v52 = vld [vmem:[#allocation2 + $0x34] sm:$0xf]  ;;  %v2838_v53 = vld [vmem:[#allocation2 + $0x48] sm:$0xf0]  ;;  %v3605_v56 = vor.u32 %v4355_v48, %v3604_v47 }
  0x3d   :  { %1913 = vmatpush.bf16.msrb.mxu2 %v2961_v55  ;;  %v4208_v54 = vld [vmem:[#allocation2 + $0x1b4] sm:$0xf]  ;;  %v3030_v55 = vld [vmem:[#allocation2 + $0x1c8] sm:$0xf0]  ;;  %v3580_v57 = vld [vmem:[#allocation2 + $0x600] sm:$0xf]  ;;  %v2841_v60 = vor.u32 %v4160_v52, %v2838_v53 }
  0x3e   :  { %1926 = vmatpush.bf16.msrb.mxu3 %v3153_v59  ;;  %v4349_v58 = vld [vmem:[#allocation2 + $0x614] sm:$0xf0]  ;;  %v3797_v59 = vor.u32 %v4403_v51, %v3796_v49  ;;  %v3772_v61 = vld [vmem:[#allocation2 + $0x780] sm:$0xf]  ;;  %v4154_v63 = vld [vmem:[#allocation2 + $0x4] sm:$0xf] }
  0x3f   :  { %1888 = vmatpush.bf16.msrb.mxu0 %v3701_v0  ;;  %v4397_v62 = vld [vmem:[#allocation2 + $0x794] sm:$0xf0]  ;;  %v3033_v0 = vor.u32 %v4208_v54, %v3030_v55  ;;  %v4202_v2 = vld [vmem:[#allocation2 + $0x184] sm:$0xf]  ;;  %v3006_v3 = vld [vmem:[#allocation2 + $0x198] sm:$0xf0]  ;;  %v3581_v7 = vor.u32 %v4349_v58, %v3580_v57 }
  0x40   :  { %1901 = vmatpush.bf16.msrb.mxu1 %v3893_v1  ;;  %v2814_v1 = vld [vmem:[#allocation2 + $0x18] sm:$0xf0]  ;;  %v4292_v4 = vld [vmem:[#allocation2 + $0x454] sm:$0xf]  ;;  %v3558_v10 = vld [vmem:[#allocation2 + $0x5e8] sm:$0xf0]  ;;  %v3773_v13 = vor.u32 %v4397_v62, %v3772_v61  ;;  %v3009_v19 = vor.u32 %v4202_v2, %v3006_v3 }
  0x41   :  { %1914 = vmatpush.bf16.msrb.mxu2 %v2937_v5  ;;  %v3366_v5 = vld [vmem:[#allocation2 + $0x468] sm:$0xf0]  ;;  %v4340_v6 = vld [vmem:[#allocation2 + $0x5d4] sm:$0xf]  ;;  %v2817_v14 = vor.u32 %v4154_v63, %v2814_v1  ;;  %v4286_v24 = vld [vmem:[#allocation2 + $0x424] sm:$0xf] }
  0x42   :  { %1927 = vmatpush.bf16.msrb.mxu3 %v3129_v11  ;;  %v4388_v11 = vld [vmem:[#allocation2 + $0x754] sm:$0xf]  ;;  %v3750_v12 = vld [vmem:[#allocation2 + $0x768] sm:$0xf0]  ;;  %v3561_v22 = vor.u32 %v4340_v6, %v3558_v10  ;;  %v4334_v27 = vld [vmem:[#allocation2 + $0x5a4] sm:$0xf] }
  0x43   :  { %1889 = vmatpush.bf16.msrb.mxu0 %v3677_v18  ;;  %v4436_v16 = vld [vmem:[#allocation2 + $0x8d4] sm:$0xf]  ;;  %v3942_v17 = vld [vmem:[#allocation2 + $0x8e8] sm:$0xf0]  ;;  %v84_v18 = vld [vmem:[%s4799_s0 + $0x20] sm:$0xff]  ;;  %v3753_v23 = vor.u32 %v4388_v11, %v3750_v12 }
  0x44   :  { %1902 = vmatpush.bf16.msrb.mxu1 %v3869_v20  ;;  %v3369_v20 = vor.u32 %v4292_v4, %v3366_v5  ;;  %v3945_v28 = vor.u32 %v4436_v16, %v3942_v17  ;;  %v3534_v29 = vld [vmem:[#allocation2 + $0x5b8] sm:$0xf0]  ;;  %v4382_v30 = vld [vmem:[#allocation2 + $0x724] sm:$0xf]  ;;  %v4280_v39 = vld [vmem:[#allocation2 + $0x3f4] sm:$0xf] }
  0x45   :  { %1915 = vmatpush.bf16.msrb.mxu2 %v2913_v21  ;;  %v85_v21 = vld [vmem:[%s4799_s0 + $0x28] sm:$0xff]  ;;  %v3726_v31 = vld [vmem:[#allocation2 + $0x738] sm:$0xf0]  ;;  %v3537_v37 = vor.u32 %v4334_v27, %v3534_v29  ;;  %v4328_v41 = vld [vmem:[#allocation2 + $0x574] sm:$0xf]  ;;  %s4653_s0 = smov [#allocation10]  }
  0x46   :  { %1928 = vmatpush.bf16.msrb.mxu3 %v3105_v26  ;;  %v3342_v26 = vld [vmem:[#allocation2 + $0x438] sm:$0xf0]  ;;  %v4728_v35 = vpack.c.bf16 %v85_v21, %v85_v21  ;;  %v3318_v40 = vld [vmem:[#allocation2 + $0x408] sm:$0xf0]  ;;  %v4274_v51 = vld [vmem:[#allocation2 + $0x3c4] sm:$0xf] }
  0x47   :  { %1890 = vmatpush.bf16.msrb.mxu0 %v3653_v32  ;;  %v4726_v32 = vpack.c.bf16 %v84_v18, %v84_v18  ;;  %v3345_v36 = vor.u32 %v4286_v24, %v3342_v26  ;;  %v3510_v43 = vld [vmem:[#allocation2 + $0x588] sm:$0xf0]  ;;  %v3321_v48 = vor.u32 %v4280_v39, %v3318_v40  ;;  %v3294_v52 = vld [vmem:[#allocation2 + $0x3d8] sm:$0xf0]  ;;  %v4322_v53 = vld [vmem:[#allocation2 + $0x544] sm:$0xf] }
  0x48   :  { %1903 = vmatpush.bf16.msrb.mxu1 %v3845_v33  ;;  %v4430_v33 = vld [vmem:[#allocation2 + $0x8a4] sm:$0xf]  ;;  %v3894_v47 = vld [vmem:[#allocation2 + $0x888] sm:$0xf0]  ;;  %v3513_v49 = vor.u32 %v4328_v41, %v3510_v43  ;;  %v3486_v55 = vld [vmem:[#allocation2 + $0x558] sm:$0xf0] }
  0x49   :  { %1916 = vmatpush.bf16.msrb.mxu2 %v2889_v34  ;;  %v3918_v34 = vld [vmem:[#allocation2 + $0x8b8] sm:$0xf0]  ;;  %v4418_v58 = vld [vmem:[#allocation2 + $0x844] sm:$0xf]  ;;  %v3489_v61 = vor.u32 %v4322_v53, %v3486_v55  ;;  %v4268_v63 = vld [vmem:[#allocation2 + $0x394] sm:$0xf] }
  0x4a   :  { %1929 = vmatpush.bf16.msrb.mxu3 %v3081_v38  ;;  %v3729_v38 = vor.u32 %v4382_v30, %v3726_v31  ;;  %v3921_v42 = vor.u32 %v4430_v33, %v3918_v34  ;;  %v3678_v57 = vld [vmem:[#allocation2 + $0x6d8] sm:$0xf0]  ;;  %v4316_v1 = vld [vmem:[#allocation2 + $0x514] sm:$0xf]  ;;  %v3462_v3 = vld [vmem:[#allocation2 + $0x528] sm:$0xf0] }
  0x4b   :  { %1891 = vmatpush.bf16.msrb.mxu0 %v3629_v44  ;;  %v4376_v44 = vld [vmem:[#allocation2 + $0x6f4] sm:$0xf]  ;;  %v3654_v5 = vld [vmem:[#allocation2 + $0x6a8] sm:$0xf0]  ;;  %v3465_v11 = vor.u32 %v4316_v1, %v3462_v3  ;;  %v4310_v16 = vld [vmem:[#allocation2 + $0x4e4] sm:$0xf] }
  0x4c   :  { %1904 = vmatpush.bf16.msrb.mxu1 %v3821_v45  ;;  %v3702_v45 = vld [vmem:[#allocation2 + $0x708] sm:$0xf0]  ;;  %v4364_v4 = vld [vmem:[#allocation2 + $0x694] sm:$0xf]  ;;  %v3438_v18 = vld [vmem:[#allocation2 + $0x4f8] sm:$0xf0] }
  0x4d   :  { %1917 = vmatpush.bf16.msrb.mxu2 %v2865_v46  ;;  %v4424_v46 = vld [vmem:[#allocation2 + $0x874] sm:$0xf]  ;;  %v3657_v12 = vor.u32 %v4364_v4, %v3654_v5  ;;  %v4406_v21 = vld [vmem:[#allocation2 + $0x7e4] sm:$0xf]  ;;  %v3441_v24 = vor.u32 %v4310_v16, %v3438_v18  ;;  %v3414_v31 = vld [vmem:[#allocation2 + $0x4c8] sm:$0xf0] }
  0x4e   :  { %1930 = vmatpush.bf16.msrb.mxu3 %v3057_v50  ;;  %v3705_v50 = vor.u32 %v4376_v44, %v3702_v45  ;;  %v3897_v54 = vor.u32 %v4424_v46, %v3894_v47  ;;  %v4412_v6 = vld [vmem:[#allocation2 + $0x814] sm:$0xf]  ;;  %v3606_v34 = vld [vmem:[#allocation2 + $0x648] sm:$0xf0]  ;;  %v4250_v39 = vld [vmem:[#allocation2 + $0x304] sm:$0xf] }
  0x4f   :  { %1892 = vmatpush.bf16.msrb.mxu0 %v3605_v56  ;;  %v4370_v56 = vld [vmem:[#allocation2 + $0x6c4] sm:$0xf]  ;;  %v4256_v27 = vld [vmem:[#allocation2 + $0x334] sm:$0xf]  ;;  %v3198_v40 = vld [vmem:[#allocation2 + $0x318] sm:$0xf0] }
  0x50   :  { %1905 = vmatpush.bf16.msrb.mxu1 %v3797_v59  ;;  %v3870_v59 = vld [vmem:[#allocation2 + $0x858] sm:$0xf0]  ;;  %v3681_v62 = vor.u32 %v4370_v56, %v3678_v57  ;;  %v4304_v29 = vld [vmem:[#allocation2 + $0x4b4] sm:$0xf]  ;;  %v4298_v43 = vld [vmem:[#allocation2 + $0x484] sm:$0xf]  ;;  %v3201_v53 = vor.u32 %v4250_v39, %v3198_v40 }
  0x51   :  { %1918 = vmatpush.bf16.msrb.mxu2 %v2841_v60  ;;  %v3297_v60 = vor.u32 %v4274_v51, %v3294_v52  ;;  %v3873_v2 = vor.u32 %v4418_v58, %v3870_v59  ;;  %v4352_v33 = vld [vmem:[#allocation2 + $0x634] sm:$0xf]  ;;  %v3417_v41 = vor.u32 %v4304_v29, %v3414_v31  ;;  %v3390_v44 = vld [vmem:[#allocation2 + $0x498] sm:$0xf0]  ;;  %v4346_v45 = vld [vmem:[#allocation2 + $0x604] sm:$0xf] }
  0x52   :  { %1931 = vmatpush.bf16.msrb.mxu3 %v3033_v0  ;;  %v3270_v0 = vld [vmem:[#allocation2 + $0x3a8] sm:$0xf0]  ;;  %v3582_v47 = vld [vmem:[#allocation2 + $0x618] sm:$0xf0]  ;;  %v4200_v51 = vld [vmem:[#allocation2 + $0x16c] sm:$0xf0]  ;;  %v3393_v57 = vor.u32 %v4298_v43, %v3390_v44 }
  0x53   :  { %1893 = vmatpush.bf16.msrb.mxu0 %v3581_v7  ;;  %v3846_v7 = vld [vmem:[#allocation2 + $0x828] sm:$0xf0]  ;;  %v3273_v10 = vor.u32 %v4268_v63, %v3270_v0  ;;  %v3180_v52 = vld [vmem:[#allocation2 + $0x2d8] sm:$0xf]  ;;  %v4296_v56 = vld [vmem:[#allocation2 + $0x46c] sm:$0xf0]  ;;  %v3585_v58 = vor.u32 %v4346_v45, %v3582_v47 }
  0x54   :  { %1906 = vmatpush.bf16.msrb.mxu1 %v3773_v13  ;;  %v4262_v13 = vld [vmem:[#allocation2 + $0x364] sm:$0xf]  ;;  %v3849_v17 = vor.u32 %v4412_v6, %v3846_v7  ;;  %v3372_v55 = vld [vmem:[#allocation2 + $0x458] sm:$0xf]  ;;  %v2964_v1 = vld [vmem:[#allocation2 + $0x128] sm:$0xf] }
  0x55   :  { %1919 = vmatpush.bf16.msrb.mxu2 %v2817_v14  ;;  %v3246_v14 = vld [vmem:[#allocation2 + $0x378] sm:$0xf0]  ;;  %v3564_v59 = vld [vmem:[#allocation2 + $0x5d8] sm:$0xf]  ;;  %v3373_v0 = vor.u32 %v4296_v56, %v3372_v55  ;;  %v3156_v3 = vld [vmem:[#allocation2 + $0x2a8] sm:$0xf] }
  0x56   :  { %1932 = vmatpush.bf16.msrb.mxu3 %v3009_v19  ;;  %1894 = vmatmul.bf16.vlgmr.msrb.gmra.mxu0 %v4726_v32  ;;  %v4358_v19 = vld [vmem:[#allocation2 + $0x664] sm:$0xf]  ;;  %v4242_v5 = vld [vmem:[#allocation2 + $0x2bc] sm:$0xf0]  ;;  %v3348_v6 = vld [vmem:[#allocation2 + $0x428] sm:$0xf] }
  0x57   :  { %1938 = vmatpush.bf16.msra.mxu0 %v3369_v20  ;;  %1907 = vmatmul.bf16.vlgmr.msrb.gmra.mxu1 %v4728_v35  ;;  %v3630_v20 = vld [vmem:[#allocation2 + $0x678] sm:$0xf0]  ;;  %v4290_v7 = vld [vmem:[#allocation2 + $0x43c] sm:$0xf0]  ;;  %v2940_v16 = vld [vmem:[#allocation2 + $0xf8] sm:$0xf] }
  0x58   :  { %1951 = vmatpush.bf16.msra.mxu1 %v3561_v22  ;;  %1920 = vmatmul.bf16.vlgmr.msrb.gmra.mxu2 %v4704_v9  ;;  %v3822_v22 = vld [vmem:[#allocation2 + $0x7f8] sm:$0xf0]  ;;  %v3633_v26 = vor.u32 %v4358_v19, %v3630_v20  ;;  %v3132_v18 = vld [vmem:[#allocation2 + $0x278] sm:$0xf]  ;;  %v4236_v20 = vld [vmem:[#allocation2 + $0x28c] sm:$0xf0] }
  0x59   :  { %1964 = vmatpush.bf16.msra.mxu2 %v3753_v23  ;;  %1933 = vmatmul.bf16.vlgmr.msrb.gmra.mxu3 %v4717_v25  ;;  %v3249_v23 = vor.u32 %v4262_v13, %v3246_v14  ;;  %v3825_v30 = vor.u32 %v4406_v21, %v3822_v22  ;;  %v3157_v13 = vor.u32 %v4242_v5, %v3156_v3  ;;  %v3324_v21 = vld [vmem:[#allocation2 + $0x3f8] sm:$0xf]  ;;  %v4284_v22 = vld [vmem:[#allocation2 + $0x40c] sm:$0xf0]  ;;  %v2916_v29 = vld [vmem:[#allocation2 + $0xc8] sm:$0xf] }
  0x5a   :  { %1977 = vmatpush.bf16.msra.mxu3 %v3945_v28  ;;  %v3222_v28 = vld [vmem:[#allocation2 + $0x348] sm:$0xf0]  ;;  %v3349_v14 = vor.u32 %v4290_v7, %v3348_v6  ;;  %v3108_v31 = vld [vmem:[#allocation2 + $0x248] sm:$0xf]  ;;  %v4326_v39 = vld [vmem:[#allocation2 + $0x55c] sm:$0xf0] }
  0x5b   :  { %1939 = vmatpush.bf16.msra.mxu0 %v3345_v36  ;;  %v4400_v36 = vld [vmem:[#allocation2 + $0x7b4] sm:$0xf]  ;;  %v2892_v43 = vld [vmem:[#allocation2 + $0x98] sm:$0xf]  ;;  %v4176_v44 = vld [vmem:[#allocation2 + $0xac] sm:$0xf0] }
  0x5c   :  { %1952 = vmatpush.bf16.msra.mxu1 %v3537_v37  ;;  %v3798_v37 = vld [vmem:[#allocation2 + $0x7c8] sm:$0xf0]  ;;  %v3084_v45 = vld [vmem:[#allocation2 + $0x218] sm:$0xf]  ;;  %v4224_v47 = vld [vmem:[#allocation2 + $0x22c] sm:$0xf0] }
  0x5d   :  { %1965 = vmatpush.bf16.msra.mxu2 %v3729_v38  ;;  %v3225_v38 = vor.u32 %v4256_v27, %v3222_v28  ;;  %v3801_v46 = vor.u32 %v4400_v36, %v3798_v37  ;;  %v3133_v27 = vor.u32 %v4236_v20, %v3132_v18  ;;  %v3325_v28 = vor.u32 %v4284_v22, %v3324_v21  ;;  %v3300_v36 = vld [vmem:[#allocation2 + $0x3c8] sm:$0xf]  ;;  %v4278_v37 = vld [vmem:[#allocation2 + $0x3dc] sm:$0xf0]  ;;  %v2844_v3 = vld [vmem:[#allocation2 + $0x38] sm:$0xf] }
  0x5e   :  { %1978 = vmatpush.bf16.msra.mxu3 %v3921_v42  ;;  %v3609_v42 = vor.u32 %v4352_v33, %v3606_v34  ;;  %v4230_v34 = vld [vmem:[#allocation2 + $0x25c] sm:$0xf0]  ;;  %v2868_v55 = vld [vmem:[#allocation2 + $0x68] sm:$0xf]  ;;  %v3036_v5 = vld [vmem:[#allocation2 + $0x1b8] sm:$0xf] }
  0x5f   :  { %1940 = vmatpush.bf16.msra.mxu0 %v3321_v48  ;;  %v4394_v48 = vld [vmem:[#allocation2 + $0x784] sm:$0xf]  ;;  %v4170_v56 = vld [vmem:[#allocation2 + $0x7c] sm:$0xf0]  ;;  %v4212_v7 = vld [vmem:[#allocation2 + $0x1cc] sm:$0xf0] }
  0x60   :  { %1953 = vmatpush.bf16.msra.mxu1 %v3513_v49  ;;  %v3774_v49 = vld [vmem:[#allocation2 + $0x798] sm:$0xf0]  ;;  %v3037_v18 = vor.u32 %v4212_v7, %v3036_v5  ;;  %v3012_v20 = vld [vmem:[#allocation2 + $0x188] sm:$0xf]  ;;  %v4206_v21 = vld [vmem:[#allocation2 + $0x19c] sm:$0xf0] }
  0x61   :  { %1966 = vmatpush.bf16.msra.mxu2 %v3705_v50  ;;  %v2988_v50 = vld [vmem:[#allocation2 + $0x158] sm:$0xf]  ;;  %v3204_v22 = vld [vmem:[#allocation2 + $0x308] sm:$0xf]  ;;  %s2796_s25 = sshll.u32 %s4653_s0, 4  ;;  %s2797_s25 = int_to_ptr.vmem [resolvable:$true] %s2796_s25 }
  0x62   :  { %1979 = vmatpush.bf16.msra.mxu3 %v3897_v54  ;;  %v4248_v54 = vld [vmem:[#allocation2 + $0x2ec] sm:$0xf0]  ;;  %v3684_v5 = vld [vmem:[#allocation2 + $0x6c8] sm:$0xf] }
  0x63   :  { %1941 = vmatpush.bf16.msra.mxu0 %v3297_v60  ;;  %v4344_v60 = vld [vmem:[#allocation2 + $0x5ec] sm:$0xf0]  ;;  %v3181_v63 = vor.u32 %v4248_v54, %v3180_v52  ;;  %v2893_v52 = vor.u32 %v4176_v44, %v2892_v43  ;;  %v3876_v7 = vld [vmem:[#allocation2 + $0x848] sm:$0xf] }
  0x64   :  { %1954 = vmatpush.bf16.msra.mxu1 %v3489_v61  ;;  %v3777_v61 = vor.u32 %v4394_v48, %v3774_v49  ;;  %v3565_v4 = vor.u32 %v4344_v60, %v3564_v59  ;;  %v3276_v48 = vld [vmem:[#allocation2 + $0x398] sm:$0xf]  ;;  %v4272_v49 = vld [vmem:[#allocation2 + $0x3ac] sm:$0xf0]  ;;  %v4218_v59 = vld [vmem:[#allocation2 + $0x1fc] sm:$0xf0] }
  0x65   :  { %1967 = vmatpush.bf16.msra.mxu2 %v3681_v62  ;;  %v2989_v62 = vor.u32 %v4200_v51, %v2988_v50  ;;  %v3468_v50 = vld [vmem:[#allocation2 + $0x518] sm:$0xf]  ;;  %v4320_v51 = vld [vmem:[#allocation2 + $0x52c] sm:$0xf0]  ;;  %v3277_v54 = vor.u32 %v4272_v49, %v3276_v48  ;;  %v3252_v60 = vld [vmem:[#allocation2 + $0x368] sm:$0xf] }
  0x66   :  { %1980 = vmatpush.bf16.msra.mxu3 %v3873_v2  ;;  %v4194_v2 = vld [vmem:[#allocation2 + $0x13c] sm:$0xf0] }
  0x67   :  { %1942 = vmatpush.bf16.msra.mxu0 %v3273_v10  ;;  %v3540_v10 = vld [vmem:[#allocation2 + $0x5a8] sm:$0xf]  ;;  %v4434_v49 = vld [vmem:[#allocation2 + $0x8bc] sm:$0xf0] }
  0x68   :  { %1955 = vmatpush.bf16.msra.mxu1 %v3465_v11  ;;  %v4338_v11 = vld [vmem:[#allocation2 + $0x5bc] sm:$0xf0] }
  0x69   :  { %1968 = vmatpush.bf16.msra.mxu2 %v3657_v12  ;;  %v2965_v12 = vor.u32 %v4194_v2, %v2964_v1  ;;  %v3541_v19 = vor.u32 %v4338_v11, %v3540_v10  ;;  %v3228_v10 = vld [vmem:[#allocation2 + $0x338] sm:$0xf]  ;;  %v4260_v11 = vld [vmem:[#allocation2 + $0x34c] sm:$0xf0] }
  0x6a   :  { %1981 = vmatpush.bf16.msra.mxu3 %v3849_v17  ;;  %v4188_v17 = vld [vmem:[#allocation2 + $0x10c] sm:$0xf0] }
  0x6b   :  { %1943 = vmatpush.bf16.msra.mxu0 %v3249_v23  ;;  %v3516_v23 = vld [vmem:[#allocation2 + $0x578] sm:$0xf] }
  0x6c   :  { %1956 = vmatpush.bf16.msra.mxu1 %v3441_v24  ;;  %v4332_v24 = vld [vmem:[#allocation2 + $0x58c] sm:$0xf0] }
  0x6d   :  { %1969 = vmatpush.bf16.msra.mxu2 %v3633_v26  ;;  %v2941_v26 = vor.u32 %v4188_v17, %v2940_v16  ;;  %v3517_v33 = vor.u32 %v4332_v24, %v3516_v23  ;;  %v2820_v16 = vld [vmem:[#allocation2 + $0x8] sm:$0xf]  ;;  %v4158_v17 = vld [vmem:[#allocation2 + $0x1c] sm:$0xf0] }
  0x6e   :  { %1982 = vmatpush.bf16.msra.mxu3 %v3825_v30  ;;  %v4182_v30 = vld [vmem:[#allocation2 + $0xdc] sm:$0xf0] }
  0x6f   :  { %1944 = vmatpush.bf16.msra.mxu0 %v3225_v38  ;;  %v3492_v38 = vld [vmem:[#allocation2 + $0x548] sm:$0xf]  ;;  %v2917_v40 = vor.u32 %v4182_v30, %v2916_v29  ;;  %v4254_v24 = vld [vmem:[#allocation2 + $0x31c] sm:$0xf0]  ;;  %v4392_v29 = vld [vmem:[#allocation2 + $0x76c] sm:$0xf0] }
  0x70   :  { %1957 = vmatpush.bf16.msra.mxu1 %v3417_v41  ;;  %v3109_v41 = vor.u32 %v4230_v34, %v3108_v31  ;;  %v3948_v30 = vld [vmem:[#allocation2 + $0x8d8] sm:$0xf]  ;;  %v2821_v31 = vor.u32 %v4158_v17, %v2820_v16  ;;  %v4197_v34 = vld [vmem:[#allocation2 + $0x15c] sm:$0xf]  ;;  %v3110_v16 = vld [vmem:[#allocation2 + $0x260] sm:$0xf0] }
  0x71   :  { %1970 = vmatpush.bf16.msra.mxu2 %v3609_v42  ;;  %v3301_v42 = vor.u32 %v4278_v37, %v3300_v36  ;;  %v2990_v36 = vld [vmem:[#allocation2 + $0x170] sm:$0xf0]  ;;  %v3013_v37 = vor.u32 %v4206_v21, %v3012_v20  ;;  %v3660_v20 = vld [vmem:[#allocation2 + $0x698] sm:$0xf]  ;;  %v4368_v21 = vld [vmem:[#allocation2 + $0x6ac] sm:$0xf0] }
  0x72   :  { %1983 = vmatpush.bf16.msra.mxu3 %v3801_v46  ;;  %v3493_v46 = vor.u32 %v4326_v39, %v3492_v38  ;;  %v3205_v38 = vor.u32 %v4254_v24, %v3204_v22  ;;  %v4245_v39 = vld [vmem:[#allocation2 + $0x2dc] sm:$0xf]  ;;  %v2993_v44 = vor.u32 %v4197_v34, %v2990_v36  ;;  %v3852_v22 = vld [vmem:[#allocation2 + $0x818] sm:$0xf]  ;;  %v4416_v24 = vld [vmem:[#allocation2 + $0x82c] sm:$0xf0] }
  0x73   :  { %1945 = vmatpush.bf16.msra.mxu0 %v3201_v53  ;;  %v3085_v53 = vor.u32 %v4224_v47, %v3084_v45  ;;  %v3732_v45 = vld [vmem:[#allocation2 + $0x728] sm:$0xf]  ;;  %v4362_v36 = vld [vmem:[#allocation2 + $0x67c] sm:$0xf0] }
  0x74   :  { %1958 = vmatpush.bf16.msra.mxu1 %v3393_v57  ;;  %v3060_v57 = vld [vmem:[#allocation2 + $0x1e8] sm:$0xf] }
  0x75   :  { %1971 = vmatpush.bf16.msra.mxu2 %v3585_v58  ;;  %v3469_v58 = vor.u32 %v4320_v51, %v3468_v50  ;;  %v3061_v1 = vor.u32 %v4218_v59, %v3060_v57  ;;  %v3924_v47 = vld [vmem:[#allocation2 + $0x8a8] sm:$0xf]  ;;  %v4191_v50 = vld [vmem:[#allocation2 + $0x12c] sm:$0xf]  ;;  %v2966_v51 = vld [vmem:[#allocation2 + $0x140] sm:$0xf0] }
  0x76   :  { %1984 = vmatpush.bf16.msra.mxu3 %v3777_v61  ;;  %1946 = vmatmul.bf16.vlgmr.msra.gmra.mxu0 %v4702_v8  ;;  %v4266_v61 = vld [vmem:[#allocation2 + $0x37c] sm:$0xf0]  ;;  %v3708_v57 = vld [vmem:[#allocation2 + $0x6f8] sm:$0xf]  ;;  %v3636_v34 = vld [vmem:[#allocation2 + $0x668] sm:$0xf] }
  0x77   :  { %1990 = vmatpush.bf16.msrb.mxu0 %v2989_v62  ;;  %1959 = vmatmul.bf16.vlgmr.msra.gmra.mxu1 %v4709_v15  ;;  %v3444_v62 = vld [vmem:[#allocation2 + $0x4e8] sm:$0xf]  ;;  %v3253_v2 = vor.u32 %v4266_v61, %v3252_v60  ;;  %v3900_v59 = vld [vmem:[#allocation2 + $0x878] sm:$0xf]  ;;  %v4428_v61 = vld [vmem:[#allocation2 + $0x88c] sm:$0xf0] }
  0x78   :  { %2003 = vmatpush.bf16.msrb.mxu1 %v3181_v63  ;;  %1972 = vmatmul.bf16.vlgmr.msra.gmra.mxu2 %v4726_v32  ;;  %v4314_v63 = vld [vmem:[#allocation2 + $0x4fc] sm:$0xf0] }
  0x79   :  { %2016 = vmatpush.bf16.msrb.mxu2 %v3373_v0  ;;  %1985 = vmatmul.bf16.vlgmr.msra.gmra.mxu3 %v4728_v35  ;;  %v2869_v0 = vor.u32 %v4170_v56, %v2868_v55  ;;  %v3445_v6 = vor.u32 %v4314_v63, %v3444_v62  ;;  %v3925_v55 = vor.u32 %v4434_v49, %v3924_v47  ;;  %v4185_v62 = vld [vmem:[#allocation2 + $0xfc] sm:$0xf]  ;;  %v2942_v63 = vld [vmem:[#allocation2 + $0x110] sm:$0xf0]  ;;  %v3612_v47 = vld [vmem:[#allocation2 + $0x638] sm:$0xf] }
  0x7a   :  { %2029 = vmatpush.bf16.msrb.mxu3 %v3565_v4  ;;  %v4164_v4 = vld [vmem:[#allocation2 + $0x4c] sm:$0xf0]  ;;  %v2969_v56 = vor.u32 %v4191_v50, %v2966_v51  ;;  %v3804_v49 = vld [vmem:[#allocation2 + $0x7b8] sm:$0xf] }
  0x7b   :  { %1991 = vmatpush.bf16.msrb.mxu0 %v2965_v12  ;;  %v3420_v12 = vld [vmem:[#allocation2 + $0x4b8] sm:$0xf]  ;;  %v4404_v51 = vld [vmem:[#allocation2 + $0x7cc] sm:$0xf0] }
  0x7c   :  { %2004 = vmatpush.bf16.msrb.mxu1 %v3157_v13  ;;  %v4308_v13 = vld [vmem:[#allocation2 + $0x4cc] sm:$0xf0] }
  0x7d   :  { %2017 = vmatpush.bf16.msrb.mxu2 %v3349_v14  ;;  %v2845_v14 = vor.u32 %v4164_v4, %v2844_v3  ;;  %v3421_v23 = vor.u32 %v4308_v13, %v3420_v12  ;;  %v3901_v3 = vor.u32 %v4428_v61, %v3900_v59  ;;  %v2945_v4 = vor.u32 %v4185_v62, %v2942_v63  ;;  %v4179_v12 = vld [vmem:[#allocation2 + $0xcc] sm:$0xf]  ;;  %v2918_v13 = vld [vmem:[#allocation2 + $0xe0] sm:$0xf0]  ;;  %v3780_v61 = vld [vmem:[#allocation2 + $0x788] sm:$0xf] }
  0x7e   :  { %2030 = vmatpush.bf16.msrb.mxu3 %v3541_v19  ;;  %v3229_v19 = vor.u32 %v4260_v11, %v3228_v10  ;;  %v4422_v11 = vld [vmem:[#allocation2 + $0x85c] sm:$0xf0]  ;;  %v3805_v59 = vor.u32 %v4404_v51, %v3804_v49  ;;  %v4155_v63 = vld [vmem:[#allocation2 + $0xc] sm:$0xf] }
  0x7f   :  { %1992 = vmatpush.bf16.msrb.mxu0 %v2941_v26  ;;  %v3396_v26 = vld [vmem:[#allocation2 + $0x488] sm:$0xf]  ;;  %v4398_v62 = vld [vmem:[#allocation2 + $0x79c] sm:$0xf0]  ;;  %v4323_v51 = vld [vmem:[#allocation2 + $0x54c] sm:$0xf] }
  0x80   :  { %2005 = vmatpush.bf16.msrb.mxu1 %v3133_v27  ;;  %v4302_v27 = vld [vmem:[#allocation2 + $0x49c] sm:$0xf0] }
  0x81   :  { %2018 = vmatpush.bf16.msrb.mxu2 %v3325_v28  ;;  %v3756_v28 = vld [vmem:[#allocation2 + $0x758] sm:$0xf] }
  0x82   :  { %2031 = vmatpush.bf16.msrb.mxu3 %v3517_v33  ;;  %v4440_v33 = vld [vmem:[#allocation2 + $0x8ec] sm:$0xf0] }
  0x83   :  { %1993 = vmatpush.bf16.msrb.mxu0 %v2917_v40  ;;  %v3182_v40 = vld [vmem:[#allocation2 + $0x2f0] sm:$0xf0]  ;;  %v3949_v43 = vor.u32 %v4440_v33, %v3948_v30  ;;  %v3661_v30 = vor.u32 %v4368_v21, %v3660_v20 }
  0x84   :  { %2006 = vmatpush.bf16.msrb.mxu1 %v3109_v41  ;;  %v3397_v41 = vor.u32 %v4302_v27, %v3396_v26  ;;  %v3185_v48 = vor.u32 %v4245_v39, %v3182_v40  ;;  %v4173_v26 = vld [vmem:[#allocation2 + $0x9c] sm:$0xf]  ;;  %v2894_v27 = vld [vmem:[#allocation2 + $0xb0] sm:$0xf0]  ;;  %v4410_v39 = vld [vmem:[#allocation2 + $0x7fc] sm:$0xf0] }
  0x85   :  { %2019 = vmatpush.bf16.msrb.mxu2 %v3301_v42  ;;  %v3757_v42 = vor.u32 %v4392_v29, %v3756_v28  ;;  %v4221_v28 = vld [vmem:[#allocation2 + $0x21c] sm:$0xf]  ;;  %v3086_v29 = vld [vmem:[#allocation2 + $0x230] sm:$0xf0]  ;;  %v2897_v33 = vor.u32 %v4173_v26, %v2894_v27  ;;  %v4167_v40 = vld [vmem:[#allocation2 + $0x6c] sm:$0xf] }
  0x86   :  { %2032 = vmatpush.bf16.msrb.mxu3 %v3493_v46  ;;  %v4386_v46 = vld [vmem:[#allocation2 + $0x73c] sm:$0xf0]  ;;  %v3542_v27 = vld [vmem:[#allocation2 + $0x5c0] sm:$0xf0] }
  0x87   :  { %1994 = vmatpush.bf16.msrb.mxu0 %v2893_v52  ;;  %v4239_v52 = vld [vmem:[#allocation2 + $0x2ac] sm:$0xf] }
  0x88   :  { %2007 = vmatpush.bf16.msrb.mxu1 %v3085_v53  ;;  %v3158_v53 = vld [vmem:[#allocation2 + $0x2c0] sm:$0xf0] }
  0x89   :  { %2020 = vmatpush.bf16.msrb.mxu2 %v3277_v54  ;;  %v3733_v54 = vor.u32 %v4386_v46, %v3732_v45  ;;  %v3161_v60 = vor.u32 %v4239_v52, %v3158_v53  ;;  %v4161_v52 = vld [vmem:[#allocation2 + $0x3c] sm:$0xf]  ;;  %v2846_v53 = vld [vmem:[#allocation2 + $0x50] sm:$0xf0] }
  0x8a   :  { %2033 = vmatpush.bf16.msrb.mxu3 %v3469_v58  ;;  %v4380_v58 = vld [vmem:[#allocation2 + $0x70c] sm:$0xf0] }
  0x8b   :  { %1995 = vmatpush.bf16.msrb.mxu0 %v2869_v0  ;;  %v4233_v0 = vld [vmem:[#allocation2 + $0x27c] sm:$0xf] }
  0x8c   :  { %2008 = vmatpush.bf16.msrb.mxu1 %v3061_v1  ;;  %v3134_v1 = vld [vmem:[#allocation2 + $0x290] sm:$0xf0] }
  0x8d   :  { %2021 = vmatpush.bf16.msrb.mxu2 %v3253_v2  ;;  %v3709_v2 = vor.u32 %v4380_v58, %v3708_v57  ;;  %v3137_v10 = vor.u32 %v4233_v0, %v3134_v1  ;;  %v3588_v57 = vld [vmem:[#allocation2 + $0x608] sm:$0xf]  ;;  %v4350_v58 = vld [vmem:[#allocation2 + $0x61c] sm:$0xf0]  ;;  %v2822_v1 = vld [vmem:[#allocation2 + $0x20] sm:$0xf0] }
  0x8e   :  { %2034 = vmatpush.bf16.msrb.mxu3 %v3445_v6  ;;  %v4374_v6 = vld [vmem:[#allocation2 + $0x6dc] sm:$0xf0] }
  0x8f   :  { %1996 = vmatpush.bf16.msrb.mxu0 %v2845_v14  ;;  %v4227_v14 = vld [vmem:[#allocation2 + $0x24c] sm:$0xf]  ;;  %v3685_v17 = vor.u32 %v4374_v6, %v3684_v5  ;;  %v3374_v5 = vld [vmem:[#allocation2 + $0x470] sm:$0xf0]  ;;  %v4341_v6 = vld [vmem:[#allocation2 + $0x5dc] sm:$0xf] }
  0x90   :  { %2009 = vmatpush.bf16.msrb.mxu1 %v3037_v18  ;;  %v3877_v18 = vor.u32 %v4422_v11, %v3876_v7  ;;  %v3589_v7 = vor.u32 %v4350_v58, %v3588_v57  ;;  %v4389_v11 = vld [vmem:[#allocation2 + $0x75c] sm:$0xf]  ;;  %v4419_v57 = vld [vmem:[#allocation2 + $0x84c] sm:$0xf]  ;;  %v3878_v58 = vld [vmem:[#allocation2 + $0x860] sm:$0xf0] }
  0x91   :  { %2022 = vmatpush.bf16.msrb.mxu2 %v3229_v19  ;;  %v2921_v19 = vor.u32 %v4179_v12, %v2918_v13  ;;  %v3758_v12 = vld [vmem:[#allocation2 + $0x770] sm:$0xf0]  ;;  %v3781_v13 = vor.u32 %v4398_v62, %v3780_v61 }
  0x92   :  { %2035 = vmatpush.bf16.msrb.mxu3 %v3421_v23  ;;  %v3113_v23 = vor.u32 %v4227_v14, %v3110_v16  ;;  %v2825_v14 = vor.u32 %v4155_v63, %v2822_v1  ;;  %v4437_v16 = vld [vmem:[#allocation2 + $0x8dc] sm:$0xf]  ;;  %v3761_v21 = vor.u32 %v4389_v11, %v3758_v12  ;;  %v3278_v63 = vld [vmem:[#allocation2 + $0x3b0] sm:$0xf0] }
  0x93   :  { %1997 = vmatpush.bf16.msrb.mxu0 %v2821_v31  ;;  %v3853_v31 = vor.u32 %v4416_v24, %v3852_v22  ;;  %v4287_v22 = vld [vmem:[#allocation2 + $0x42c] sm:$0xf] }
  0x94   :  { %2010 = vmatpush.bf16.msrb.mxu1 %v3013_v37  ;;  %v3828_v37 = vld [vmem:[#allocation2 + $0x7e8] sm:$0xf]  ;;  %v4335_v24 = vld [vmem:[#allocation2 + $0x5ac] sm:$0xf] }
  0x95   :  { %2023 = vmatpush.bf16.msrb.mxu2 %v3205_v38  ;;  %v3089_v38 = vor.u32 %v4221_v28, %v3086_v29  ;;  %v3829_v45 = vor.u32 %v4410_v39, %v3828_v37  ;;  %v4383_v28 = vld [vmem:[#allocation2 + $0x72c] sm:$0xf]  ;;  %v3734_v29 = vld [vmem:[#allocation2 + $0x740] sm:$0xf0]  ;;  %v4281_v37 = vld [vmem:[#allocation2 + $0x3fc] sm:$0xf] }
  0x96   :  { %2036 = vmatpush.bf16.msrb.mxu3 %v3397_v41  ;;  %1998 = vmatmul.bf16.vlgmr.msrb.gmra.mxu0 %v4704_v9  ;;  %v2870_v41 = vld [vmem:[#allocation2 + $0x80] sm:$0xf0]  ;;  %v4329_v39 = vld [vmem:[#allocation2 + $0x57c] sm:$0xf] }
  0x97   :  { %2042 = vmatpush.bf16.msra.mxu0 %v3757_v42  ;;  %2011 = vmatmul.bf16.vlgmr.msrb.gmra.mxu1 %v4717_v25  ;;  %v4215_v42 = vld [vmem:[#allocation2 + $0x1ec] sm:$0xf]  ;;  %v2873_v46 = vor.u32 %v4167_v40, %v2870_v41  ;;  %v3518_v41 = vld [vmem:[#allocation2 + $0x590] sm:$0xf0] }
  0x98   :  { %2055 = vmatpush.bf16.msra.mxu1 %v3949_v43  ;;  %2024 = vmatmul.bf16.vlgmr.msrb.gmra.mxu2 %v4702_v8  ;;  %v3062_v43 = vld [vmem:[#allocation2 + $0x200] sm:$0xf0] }
  0x99   :  { %2068 = vmatpush.bf16.msra.mxu2 %v2993_v44  ;;  %2037 = vmatmul.bf16.vlgmr.msrb.gmra.mxu3 %v4709_v15  ;;  %v3637_v44 = vor.u32 %v4362_v36, %v3636_v34  ;;  %v3065_v50 = vor.u32 %v4215_v42, %v3062_v43  ;;  %v3545_v34 = vor.u32 %v4335_v24, %v3542_v27  ;;  %v4377_v42 = vld [vmem:[#allocation2 + $0x6fc] sm:$0xf]  ;;  %v3710_v43 = vld [vmem:[#allocation2 + $0x710] sm:$0xf0]  ;;  %v3830_v24 = vld [vmem:[#allocation2 + $0x800] sm:$0xf0] }
  0x9a   :  { %2081 = vmatpush.bf16.msra.mxu3 %v3185_v48  ;;  %v4356_v48 = vld [vmem:[#allocation2 + $0x64c] sm:$0xf0]  ;;  %v3737_v36 = vor.u32 %v4383_v28, %v3734_v29  ;;  %v3713_v49 = vor.u32 %v4377_v42, %v3710_v43  ;;  %v3806_v42 = vld [vmem:[#allocation2 + $0x7d0] sm:$0xf0] }
  0x9b   :  { %2043 = vmatpush.bf16.msra.mxu0 %v3733_v54  ;;  %v4209_v54 = vld [vmem:[#allocation2 + $0x1bc] sm:$0xf] }
  0x9c   :  { %2056 = vmatpush.bf16.msra.mxu1 %v3925_v55  ;;  %v3038_v55 = vld [vmem:[#allocation2 + $0x1d0] sm:$0xf0] }
  0x9d   :  { %2069 = vmatpush.bf16.msra.mxu2 %v2969_v56  ;;  %v3613_v56 = vor.u32 %v4356_v48, %v3612_v47  ;;  %v3041_v0 = vor.u32 %v4209_v54, %v3038_v55  ;;  %v4275_v47 = vld [vmem:[#allocation2 + $0x3cc] sm:$0xf]  ;;  %v3521_v48 = vor.u32 %v4329_v39, %v3518_v41  ;;  %v3686_v55 = vld [vmem:[#allocation2 + $0x6e0] sm:$0xf0]  ;;  %v3614_v39 = vld [vmem:[#allocation2 + $0x650] sm:$0xf0] }
  0x9e   :  { %2082 = vmatpush.bf16.msra.mxu3 %v3161_v60  ;;  %v2849_v60 = vor.u32 %v4161_v52, %v2846_v53  ;;  %v3494_v52 = vld [vmem:[#allocation2 + $0x560] sm:$0xf0]  ;;  %v4371_v54 = vld [vmem:[#allocation2 + $0x6cc] sm:$0xf]  ;;  %v4401_v41 = vld [vmem:[#allocation2 + $0x7bc] sm:$0xf] }
  0x9f   :  { %2044 = vmatpush.bf16.msra.mxu0 %v3709_v2  ;;  %v4203_v2 = vld [vmem:[#allocation2 + $0x18c] sm:$0xf]  ;;  %v3497_v61 = vor.u32 %v4323_v51, %v3494_v52  ;;  %v3689_v62 = vor.u32 %v4371_v54, %v3686_v55  ;;  %v3398_v52 = vld [vmem:[#allocation2 + $0x4a0] sm:$0xf0]  ;;  %v3809_v55 = vor.u32 %v4401_v41, %v3806_v42 }
  0xa0   :  { %2057 = vmatpush.bf16.msra.mxu1 %v3901_v3  ;;  %v3014_v3 = vld [vmem:[#allocation2 + $0x1a0] sm:$0xf0]  ;;  %v4299_v51 = vld [vmem:[#allocation2 + $0x48c] sm:$0xf] }
  0xa1   :  { %2070 = vmatpush.bf16.msra.mxu2 %v2945_v4  ;;  %v4293_v4 = vld [vmem:[#allocation2 + $0x45c] sm:$0xf] }
  0xa2   :  { %2083 = vmatpush.bf16.msra.mxu3 %v3137_v10  ;;  %v3566_v10 = vld [vmem:[#allocation2 + $0x5f0] sm:$0xf0] }
  0xa3   :  { %2045 = vmatpush.bf16.msra.mxu0 %v3685_v17  ;;  %v3950_v17 = vld [vmem:[#allocation2 + $0x8f0] sm:$0xf0]  ;;  %v3569_v20 = vor.u32 %v4341_v6, %v3566_v10  ;;  %v4413_v6 = vld [vmem:[#allocation2 + $0x81c] sm:$0xf] }
  0xa4   :  { %2058 = vmatpush.bf16.msra.mxu1 %v3877_v18  ;;  %v3017_v18 = vor.u32 %v4203_v2, %v3014_v3  ;;  %v3953_v26 = vor.u32 %v4437_v16, %v3950_v17  ;;  %v3881_v2 = vor.u32 %v4419_v57, %v3878_v58  ;;  %v3470_v3 = vld [vmem:[#allocation2 + $0x530] sm:$0xf0]  ;;  %v3254_v16 = vld [vmem:[#allocation2 + $0x380] sm:$0xf0]  ;;  %v4311_v17 = vld [vmem:[#allocation2 + $0x4ec] sm:$0xf] }
  0xa5   :  { %2071 = vmatpush.bf16.msra.mxu2 %v2921_v19  ;;  %v3377_v19 = vor.u32 %v4293_v4, %v3374_v5  ;;  %v4365_v4 = vld [vmem:[#allocation2 + $0x69c] sm:$0xf]  ;;  %v3662_v5 = vld [vmem:[#allocation2 + $0x6b0] sm:$0xf0]  ;;  %v3590_v57 = vld [vmem:[#allocation2 + $0x620] sm:$0xf0] }
  0xa6   :  { %2084 = vmatpush.bf16.msra.mxu3 %v3113_v23  ;;  %v3350_v23 = vld [vmem:[#allocation2 + $0x440] sm:$0xf0]  ;;  %v4395_v58 = vld [vmem:[#allocation2 + $0x78c] sm:$0xf] }
  0xa7   :  { %2046 = vmatpush.bf16.msra.mxu0 %v3661_v30  ;;  %v4431_v30 = vld [vmem:[#allocation2 + $0x8ac] sm:$0xf] }
  0xa8   :  { %2059 = vmatpush.bf16.msra.mxu1 %v3853_v31  ;;  %v3926_v31 = vld [vmem:[#allocation2 + $0x8c0] sm:$0xf0] }
  0xa9   :  { %2072 = vmatpush.bf16.msra.mxu2 %v2897_v33  ;;  %v3353_v33 = vor.u32 %v4287_v22, %v3350_v23  ;;  %v3929_v40 = vor.u32 %v4431_v30, %v3926_v31  ;;  %v3638_v22 = vld [vmem:[#allocation2 + $0x680] sm:$0xf0]  ;;  %v4407_v23 = vld [vmem:[#allocation2 + $0x7ec] sm:$0xf]  ;;  %v4257_v30 = vld [vmem:[#allocation2 + $0x33c] sm:$0xf] }
  0xaa   :  { %2085 = vmatpush.bf16.msra.mxu3 %v3089_v38  ;;  %v3326_v38 = vld [vmem:[#allocation2 + $0x410] sm:$0xf0] }
  0xab   :  { %2047 = vmatpush.bf16.msra.mxu0 %v3637_v44  ;;  %v4425_v44 = vld [vmem:[#allocation2 + $0x87c] sm:$0xf]  ;;  %v3230_v31 = vld [vmem:[#allocation2 + $0x350] sm:$0xf0] }
  0xac   :  { %2060 = vmatpush.bf16.msra.mxu1 %v3829_v45  ;;  %v3902_v45 = vld [vmem:[#allocation2 + $0x890] sm:$0xf0] }
  0xad   :  { %2073 = vmatpush.bf16.msra.mxu2 %v2873_v46  ;;  %v3329_v46 = vor.u32 %v4281_v37, %v3326_v38  ;;  %v3905_v53 = vor.u32 %v4425_v44, %v3902_v45  ;;  %v3422_v37 = vld [vmem:[#allocation2 + $0x4d0] sm:$0xf0]  ;;  %v4353_v38 = vld [vmem:[#allocation2 + $0x63c] sm:$0xf]  ;;  %v3233_v45 = vor.u32 %v4257_v30, %v3230_v31  ;;  %v2948_v30 = vld [vmem:[#allocation2 + $0x100] sm:$0xf] }
  0xae   :  { %2086 = vmatpush.bf16.msra.mxu3 %v3065_v50  ;;  %v3302_v50 = vld [vmem:[#allocation2 + $0x3e0] sm:$0xf0]  ;;  %v4189_v31 = vld [vmem:[#allocation2 + $0x114] sm:$0xf0] }
  0xaf   :  { %2048 = vmatpush.bf16.msra.mxu0 %v3613_v56  ;;  %v4746_v56 = vld [vmem:[#allocation5] sm:$0x3f]  ;;  %v2949_v41 = vor.u32 %v4189_v31, %v2948_v30 }
  0xb0   :  { %2061 = vmatpush.bf16.msra.mxu1 %v3805_v59  ;;  %v3305_v59 = vor.u32 %v4275_v47, %v3302_v50  ;;  %v382_v1 = vperm.slane %v4746_v56, 0  ;;  %v3206_v47 = vld [vmem:[#allocation2 + $0x320] sm:$0xf0]  ;;  %v3617_v50 = vor.u32 %v4353_v38, %v3614_v39  ;;  %v4285_v38 = vld [vmem:[#allocation2 + $0x414] sm:$0xf0] }
  0xb1   :  { %2074 = vmatpush.bf16.msra.mxu2 %v2849_v60  ;;  %v4269_v60 = vld [vmem:[#allocation2 + $0x39c] sm:$0xf]  ;;  %v3524_v39 = vld [vmem:[#allocation2 + $0x580] sm:$0xf] }
  0xb2   :  { %2087 = vmatpush.bf16.msra.mxu3 %v3041_v0  ;;  %v4317_v0 = vld [vmem:[#allocation2 + $0x51c] sm:$0xf]  ;;  %v3281_v10 = vor.u32 %v4269_v60, %v3278_v63  ;;  %v2996_v60 = vld [vmem:[#allocation2 + $0x160] sm:$0xf] }
  0xb3   :  { %2049 = vmatpush.bf16.msra.mxu0 %v3589_v7  ;;  %v3854_v7 = vld [vmem:[#allocation2 + $0x830] sm:$0xf0]  ;;  %v1843_v11 = vpop.f32.mrf.mxu0  ;;  %v3473_v12 = vor.u32 %v4317_v0, %v3470_v3  ;;  %v4249_v0 = vld [vmem:[#allocation2 + $0x2f4] sm:$0xf0]  ;;  %v2852_v31 = vld [vmem:[#allocation2 + $0x40] sm:$0xf] }
  0xb4   :  { %2062 = vmatpush.bf16.msra.mxu1 %v3781_v13  ;;  %v3665_v13 = vor.u32 %v4365_v4, %v3662_v5  ;;  %v3401_v4 = vor.u32 %v4299_v51, %v3398_v52  ;;  %v3500_v51 = vld [vmem:[#allocation2 + $0x550] sm:$0xf]  ;;  %v4327_v52 = vld [vmem:[#allocation2 + $0x564] sm:$0xf0] }
  0xb5   :  { %2075 = vmatpush.bf16.msra.mxu2 %v2825_v14  ;;  %v4263_v14 = vld [vmem:[#allocation2 + $0x36c] sm:$0xf] }
  0xb6   :  { %2088 = vmatpush.bf16.msra.mxu3 %v3017_v18  ;;  %2050 = vmatmul.bf16.vlgmr.msra.gmra.mxu0 %v4726_v32  ;;  %v1844_v18 = vadd.f32 %v1843_v11, %v382_v1  ;;  %v3380_v1 = vld [vmem:[#allocation2 + $0x460] sm:$0xf] }
  0xb7   :  { %2094 = vmatpush.bf16.msrb.mxu0 %v3377_v19  ;;  %2063 = vmatmul.bf16.vlgmr.msra.gmra.mxu1 %v4728_v35  ;;  %v3857_v19 = vor.u32 %v4413_v6, %v3854_v7  ;;  %v1856_v27 = vpop.f32.mrf.mxu1  ;;  %v3572_v6 = vld [vmem:[#allocation2 + $0x5e0] sm:$0xf]  ;;  %v4345_v7 = vld [vmem:[#allocation2 + $0x5f4] sm:$0xf0] }
  0xb8   :  { %2107 = vmatpush.bf16.msrb.mxu1 %v3569_v20  ;;  %2076 = vmatmul.bf16.vlgmr.msra.gmra.mxu2 %v4704_v9  ;;  %v3446_v20 = vld [vmem:[#allocation2 + $0x500] sm:$0xf0] }
  0xb9   :  { %2120 = vmatpush.bf16.msrb.mxu2 %v3761_v21  ;;  %2089 = vmatmul.bf16.vlgmr.msra.gmra.mxu3 %v4717_v25  ;;  %v4359_v21 = vld [vmem:[#allocation2 + $0x66c] sm:$0xf]  ;;  %v3449_v28 = vor.u32 %v4311_v17, %v3446_v20  ;;  %v4195_v17 = vld [vmem:[#allocation2 + $0x144] sm:$0xf0]  ;;  %v3573_v20 = vor.u32 %v4345_v7, %v3572_v6  ;;  %v4321_v6 = vld [vmem:[#allocation2 + $0x534] sm:$0xf0] }
  0xba   :  { %2133 = vmatpush.bf16.msrb.mxu3 %v3953_v26  ;;  %v3257_v26 = vor.u32 %v4263_v14, %v3254_v16  ;;  %v3641_v29 = vor.u32 %v4359_v21, %v3638_v22  ;;  %v2972_v16 = vld [vmem:[#allocation2 + $0x130] sm:$0xf]  ;;  %v4243_v21 = vld [vmem:[#allocation2 + $0x2c4] sm:$0xf0]  ;;  %v383_v7 = vperm.slane %v4746_v56, 1 }
  0xbb   :  { %2095 = vmatpush.bf16.msrb.mxu0 %v3353_v33  ;;  %v4305_v33 = vld [vmem:[#allocation2 + $0x4bc] sm:$0xf]  ;;  %v3356_v22 = vld [vmem:[#allocation2 + $0x430] sm:$0xf] }
  0xbc   :  { %2108 = vmatpush.bf16.msrb.mxu1 %v3545_v34  ;;  %v1857_v34 = vadd.f32 %v1856_v27, %v1844_v18  ;;  %v1882_v44 = vpop.f32.mrf.mxu3  ;;  %v3164_v18 = vld [vmem:[#allocation2 + $0x2b0] sm:$0xf]  ;;  %v2973_v27 = vor.u32 %v4195_v17, %v2972_v16  ;;  %v4219_v17 = vld [vmem:[#allocation2 + $0x204] sm:$0xf0] }
  0xbd   :  { %2121 = vmatpush.bf16.msrb.mxu2 %v3737_v36  ;;  %v3833_v36 = vor.u32 %v4407_v23, %v3830_v24  ;;  %v4291_v23 = vld [vmem:[#allocation2 + $0x444] sm:$0xf0]  ;;  %v3548_v24 = vld [vmem:[#allocation2 + $0x5b0] sm:$0xf] }
  0xbe   :  { %2134 = vmatpush.bf16.msrb.mxu3 %v3929_v40  ;;  %v1869_v40 = vpop.f32.mrf.mxu2 }
  0xbf   :  { %2096 = vmatpush.bf16.msrb.mxu0 %v3329_v46  ;;  %v1870_v43 = vadd.f32 %v1869_v40, %v1857_v34  ;;  %v4251_v46 = vld [vmem:[#allocation2 + $0x30c] sm:$0xf]  ;;  %v1858_v3 = vpop.f32.mrf.mxu1  ;;  %v4333_v40 = vld [vmem:[#allocation2 + $0x594] sm:$0xf0] }
  0xc0   :  { %2109 = vmatpush.bf16.msrb.mxu1 %v3521_v48  ;;  %v1845_v48 = vpop.f32.mrf.mxu0  ;;  %v3209_v63 = vor.u32 %v4251_v46, %v3206_v47  ;;  %v3116_v46 = vld [vmem:[#allocation2 + $0x250] sm:$0xf]  ;;  %v3525_v47 = vor.u32 %v4333_v40, %v3524_v39  ;;  %v4273_v3 = vld [vmem:[#allocation2 + $0x3b4] sm:$0xf0]  ;;  %v3236_v39 = vld [vmem:[#allocation2 + $0x340] sm:$0xf] }
  0xc1   :  { %2122 = vmatpush.bf16.msrb.mxu2 %v3713_v49  ;;  %v3425_v49 = vor.u32 %v4305_v33, %v3422_v37  ;;  %v4749_v54 = vadd.f32 %v1882_v44, %v1870_v43  ;;  %v3140_v33 = vld [vmem:[#allocation2 + $0x280] sm:$0xf]  ;;  %v2924_v44 = vld [vmem:[#allocation2 + $0xd0] sm:$0xf]  ;;  %v4231_v48 = vld [vmem:[#allocation2 + $0x264] sm:$0xf0] }
  0xc2   :  { %2135 = vmatpush.bf16.msrb.mxu3 %v3905_v53  ;;  %v4347_v53 = vld [vmem:[#allocation2 + $0x60c] sm:$0xf]  ;;  %v3332_v37 = vld [vmem:[#allocation2 + $0x400] sm:$0xf]  ;;  %v4261_v40 = vld [vmem:[#allocation2 + $0x354] sm:$0xf0] }
  0xc3   :  { %2097 = vmatpush.bf16.msrb.mxu0 %v3305_v59  ;;  %v3782_v59 = vld [vmem:[#allocation2 + $0x7a0] sm:$0xf0]  ;;  %v3593_v5 = vor.u32 %v4347_v53, %v3590_v57  ;;  %v3333_v43 = vor.u32 %v4285_v38, %v3332_v37  ;;  %v4213_v38 = vld [vmem:[#allocation2 + $0x1d4] sm:$0xf0] }
  0xc4   :  { %2110 = vmatpush.bf16.msrb.mxu1 %v3497_v61  ;;  %v4201_v61 = vld [vmem:[#allocation2 + $0x174] sm:$0xf0] }
  0xc5   :  { %2123 = vmatpush.bf16.msrb.mxu2 %v3689_v62  ;;  %v3188_v62 = vld [vmem:[#allocation2 + $0x2e0] sm:$0xf]  ;;  %v2997_v11 = vor.u32 %v4201_v61, %v2996_v60 }
  0xc6   :  { %2136 = vmatpush.bf16.msrb.mxu3 %v3881_v2  ;;  %v4297_v2 = vld [vmem:[#allocation2 + $0x474] sm:$0xf0]  ;;  %v2900_v61 = vld [vmem:[#allocation2 + $0xa0] sm:$0xf] }
  0xc7   :  { %2098 = vmatpush.bf16.msrb.mxu0 %v3281_v10  ;;  %v3785_v10 = vor.u32 %v4395_v58, %v3782_v59  ;;  %v3381_v14 = vor.u32 %v4297_v2, %v3380_v1  ;;  %v3117_v59 = vor.u32 %v4231_v48, %v3116_v46  ;;  %v4225_v1 = vld [vmem:[#allocation2 + $0x234] sm:$0xf0]  ;;  %v3284_v2 = vld [vmem:[#allocation2 + $0x3a0] sm:$0xf]  ;;  %v3020_v48 = vld [vmem:[#allocation2 + $0x190] sm:$0xf] }
  0xc8   :  { %2111 = vmatpush.bf16.msrb.mxu1 %v3473_v12  ;;  %v1871_v12 = vpop.f32.mrf.mxu2 }
  0xc9   :  { %2124 = vmatpush.bf16.msrb.mxu2 %v3665_v13  ;;  %v3189_v13 = vor.u32 %v4249_v0, %v3188_v62  ;;  %v4177_v62 = vld [vmem:[#allocation2 + $0xb4] sm:$0xf0]  ;;  %v3501_v0 = vor.u32 %v4327_v52, %v3500_v51  ;;  %v2876_v12 = vld [vmem:[#allocation2 + $0x70] sm:$0xf]  ;;  %v4255_v52 = vld [vmem:[#allocation2 + $0x324] sm:$0xf0] }
  0xca   :  { %2137 = vmatpush.bf16.msrb.mxu3 %v3857_v19  ;;  %v1884_v19 = vpop.f32.mrf.mxu3 }
  0xcb   :  { %2099 = vmatpush.bf16.msrb.mxu0 %v3257_v26  ;;  %v4339_v26 = vld [vmem:[#allocation2 + $0x5c4] sm:$0xf0] }
  0xcc   :  { %2112 = vmatpush.bf16.msrb.mxu1 %v3449_v28  ;;  %v3165_v28 = vor.u32 %v4243_v21, %v3164_v18  ;;  %v3549_v34 = vor.u32 %v4339_v26, %v3548_v24  ;;  %v3260_v18 = vld [vmem:[#allocation2 + $0x370] sm:$0xf]  ;;  %v4267_v19 = vld [vmem:[#allocation2 + $0x384] sm:$0xf0] }
  0xcd   :  { %2125 = vmatpush.bf16.msrb.mxu2 %v3641_v29  ;;  %v3357_v29 = vor.u32 %v4291_v23, %v3356_v22  ;;  %v3452_v21 = vld [vmem:[#allocation2 + $0x4f0] sm:$0xf]  ;;  %v4315_v22 = vld [vmem:[#allocation2 + $0x504] sm:$0xf0]  ;;  %v3261_v30 = vor.u32 %v4267_v19, %v3260_v18  ;;  %v4192_v18 = vld [vmem:[#allocation2 + $0x134] sm:$0xf] }
  0xce   :  { %2138 = vmatpush.bf16.msrb.mxu3 %v3833_v36  ;;  %v4237_v36 = vld [vmem:[#allocation2 + $0x294] sm:$0xf0]  ;;  %v3453_v37 = vor.u32 %v4315_v22, %v3452_v21  ;;  %v2974_v19 = vld [vmem:[#allocation2 + $0x148] sm:$0xf0] }
  0xcf   :  { %2100 = vmatpush.bf16.msrb.mxu0 %v3233_v45  ;;  %v3141_v42 = vor.u32 %v4237_v36, %v3140_v33  ;;  %v4183_v45 = vld [vmem:[#allocation2 + $0xe4] sm:$0xf0]  ;;  %v4165_v33 = vld [vmem:[#allocation2 + $0x54] sm:$0xf0]  ;;  %v3166_v21 = vld [vmem:[#allocation2 + $0x2c8] sm:$0xf0] }
  0xd0   :  { %2113 = vmatpush.bf16.msrb.mxu1 %v3425_v49  ;;  %v3308_v49 = vld [vmem:[#allocation2 + $0x3d0] sm:$0xf] }
  0xd1   :  { %2126 = vmatpush.bf16.msrb.mxu2 %v3617_v50  ;;  %v4279_v50 = vld [vmem:[#allocation2 + $0x3e4] sm:$0xf0] }
  0xd2   :  { %2139 = vmatpush.bf16.msrb.mxu3 %v3809_v55  ;;  %v2925_v55 = vor.u32 %v4183_v45, %v2924_v44  ;;  %v3309_v60 = vor.u32 %v4279_v50, %v3308_v49  ;;  %v2828_v44 = vld [vmem:[#allocation2 + $0x10] sm:$0xf]  ;;  %v4159_v45 = vld [vmem:[#allocation2 + $0x24] sm:$0xf0] }
  0xd3   :  { %2101 = vmatpush.bf16.msrb.mxu0 %v3209_v63  ;;  %v1895_v53 = vpop.f32.mrf.mxu0  ;;  %v3092_v63 = vld [vmem:[#allocation2 + $0x220] sm:$0xf]  ;;  %v4207_v49 = vld [vmem:[#allocation2 + $0x1a4] sm:$0xf0]  ;;  %v3212_v50 = vld [vmem:[#allocation2 + $0x310] sm:$0xf] }
  0xd4   :  { %2114 = vmatpush.bf16.msrb.mxu1 %v3401_v4  ;;  %v1896_v57 = vadd.f32 %v1895_v53, %v4749_v54  ;;  %v1908_v58 = vpop.f32.mrf.mxu1  ;;  %v2901_v54 = vor.u32 %v4177_v62, %v2900_v61  ;;  %v3404_v53 = vld [vmem:[#allocation2 + $0x490] sm:$0xf]  ;;  %v2829_v62 = vor.u32 %v4159_v45, %v2828_v44  ;;  %v4423_v45 = vld [vmem:[#allocation2 + $0x864] sm:$0xf0] }
  0xd5   :  { %2127 = vmatpush.bf16.msrb.mxu2 %v3593_v5  ;;  %v3476_v5 = vld [vmem:[#allocation2 + $0x520] sm:$0xf] }
  0xd6   :  { %2140 = vmatpush.bf16.msrb.mxu3 %v3785_v10  ;;  %2102 = vmatmul.bf16.vlgmr.msrb.gmra.mxu0 %v4702_v8  ;;  %v4756_v4 = vadd.f32 %v1908_v58, %v1896_v57  ;;  %v3093_v10 = vor.u32 %v4225_v1, %v3092_v63  ;;  %v3477_v16 = vor.u32 %v4321_v6, %v3476_v5  ;;  %v3764_v58 = vld [vmem:[#allocation2 + $0x760] sm:$0xf]  ;;  %v4441_v63 = vld [vmem:[#allocation2 + $0x8f4] sm:$0xf0]  ;;  %v2998_v1 = vld [vmem:[#allocation2 + $0x178] sm:$0xf0] }
  0xd7   :  { %2146 = vmatpush.bf16.msra.mxu0 %v2997_v11  ;;  %2115 = vmatmul.bf16.vlgmr.msrb.gmra.mxu1 %v4709_v15  ;;  %v3285_v11 = vor.u32 %v4273_v3, %v3284_v2  ;;  %v3021_v2 = vor.u32 %v4207_v49, %v3020_v48  ;;  %v3213_v3 = vor.u32 %v4255_v52, %v3212_v50  ;;  %v4246_v5 = vld [vmem:[#allocation2 + $0x2e4] sm:$0xf]  ;;  %v3190_v6 = vld [vmem:[#allocation2 + $0x2f8] sm:$0xf0]  ;;  %v4228_v48 = vld [vmem:[#allocation2 + $0x254] sm:$0xf] }
  0xd8   :  { %2159 = vmatpush.bf16.msra.mxu1 %v3189_v13  ;;  %2128 = vmatmul.bf16.vlgmr.msrb.gmra.mxu2 %v4726_v32  ;;  %v4171_v13 = vld [vmem:[#allocation2 + $0x84] sm:$0xf0]  ;;  %v3118_v49 = vld [vmem:[#allocation2 + $0x268] sm:$0xf0] }
  0xd9   :  { %2172 = vmatpush.bf16.msra.mxu2 %v3381_v14  ;;  %2141 = vmatmul.bf16.vlgmr.msrb.gmra.mxu3 %v4728_v35  ;;  %v3068_v14 = vld [vmem:[#allocation2 + $0x1f0] sm:$0xf] }
  0xda   :  { %2185 = vmatpush.bf16.msra.mxu3 %v3573_v20 }
  0xdb   :  { %2147 = vmatpush.bf16.msra.mxu0 %v2973_v27  ;;  %v1921_v20 = vpop.f32.mrf.mxu2  ;;  %v1897_v26 = vpop.f32.mrf.mxu0  ;;  %v2877_v27 = vor.u32 %v4171_v13, %v2876_v12  ;;  %v3740_v12 = vld [vmem:[#allocation2 + $0x730] sm:$0xf]  ;;  %v4387_v13 = vld [vmem:[#allocation2 + $0x744] sm:$0xf0] }
  0xdc   :  { %2160 = vmatpush.bf16.msra.mxu1 %v3165_v28  ;;  %v1922_v23 = vadd.f32 %v1921_v20, %v383_v7  ;;  %v1934_v24 = vpop.f32.mrf.mxu3  ;;  %v1910_v28 = vpop.f32.mrf.mxu1  ;;  %v4240_v20 = vld [vmem:[#allocation2 + $0x2b4] sm:$0xf]  ;;  %v3741_v22 = vor.u32 %v4387_v13, %v3740_v12  ;;  %v3716_v26 = vld [vmem:[#allocation2 + $0x700] sm:$0xf]  ;;  %v4411_v13 = vld [vmem:[#allocation2 + $0x804] sm:$0xf0] }
  0xdd   :  { %2173 = vmatpush.bf16.msra.mxu2 %v3357_v29  ;;  %v3069_v29 = vor.u32 %v4219_v17, %v3068_v14  ;;  %v3932_v14 = vld [vmem:[#allocation2 + $0x8b0] sm:$0xf]  ;;  %v4435_v17 = vld [vmem:[#allocation2 + $0x8c4] sm:$0xf0]  ;;  %v3908_v28 = vld [vmem:[#allocation2 + $0x880] sm:$0xf] }
  0xde   :  { %2186 = vmatpush.bf16.msra.mxu3 %v3549_v34  ;;  %v3044_v34 = vld [vmem:[#allocation2 + $0x1c0] sm:$0xf]  ;;  %v4759_v36 = vadd.f32 %v1934_v24, %v1922_v23  ;;  %v3933_v23 = vor.u32 %v4435_v17, %v3932_v14  ;;  %v2977_v24 = vor.u32 %v4192_v18, %v2974_v19  ;;  %v4168_v14 = vld [vmem:[#allocation2 + $0x74] sm:$0xf] }
  0xdf   :  { %2148 = vmatpush.bf16.msra.mxu0 %v2949_v41  ;;  %v3428_v41 = vld [vmem:[#allocation2 + $0x4c0] sm:$0xf]  ;;  %v3045_v46 = vor.u32 %v4213_v38, %v3044_v34  ;;  %v4234_v34 = vld [vmem:[#allocation2 + $0x284] sm:$0xf]  ;;  %v4216_v19 = vld [vmem:[#allocation2 + $0x1f4] sm:$0xf] }
  0xe0   :  { %2161 = vmatpush.bf16.msra.mxu1 %v3141_v42  ;;  %v4309_v42 = vld [vmem:[#allocation2 + $0x4d4] sm:$0xf0] }
  0xe1   :  { %2174 = vmatpush.bf16.msra.mxu2 %v3333_v43  ;;  %v2853_v43 = vor.u32 %v4165_v33, %v2852_v31  ;;  %v3429_v51 = vor.u32 %v4309_v42, %v3428_v41  ;;  %v4186_v31 = vld [vmem:[#allocation2 + $0x104] sm:$0xf]  ;;  %v2950_v33 = vld [vmem:[#allocation2 + $0x118] sm:$0xf0]  ;;  %v3692_v41 = vld [vmem:[#allocation2 + $0x6d0] sm:$0xf] }
  0xe2   :  { %2187 = vmatpush.bf16.msra.mxu3 %v3525_v47  ;;  %v3237_v47 = vor.u32 %v4261_v40, %v3236_v39  ;;  %v2953_v40 = vor.u32 %v4186_v31, %v2950_v33  ;;  %v4375_v42 = vld [vmem:[#allocation2 + $0x6e4] sm:$0xf0]  ;;  %v4405_v33 = vld [vmem:[#allocation2 + $0x7d4] sm:$0xf0] }
  0xe3   :  { %2149 = vmatpush.bf16.msra.mxu0 %v2925_v55  ;;  %v4303_v55 = vld [vmem:[#allocation2 + $0x4a4] sm:$0xf0]  ;;  %v1923_v57 = vpop.f32.mrf.mxu2  ;;  %v3693_v50 = vor.u32 %v4375_v42, %v3692_v41  ;;  %v3596_v41 = vld [vmem:[#allocation2 + $0x610] sm:$0xf] }
  0xe4   :  { %2162 = vmatpush.bf16.msra.mxu1 %v3117_v59  ;;  %v4393_v59 = vld [vmem:[#allocation2 + $0x774] sm:$0xf0]  ;;  %v1936_v61 = vpop.f32.mrf.mxu3  ;;  %v3405_v7 = vor.u32 %v4303_v55, %v3404_v53  ;;  %v3668_v55 = vld [vmem:[#allocation2 + $0x6a0] sm:$0xf]  ;;  %v4351_v42 = vld [vmem:[#allocation2 + $0x624] sm:$0xf0] }
  0xe5   :  { %2175 = vmatpush.bf16.msra.mxu2 %v3309_v60  ;;  %v3956_v60 = vld [vmem:[#allocation2 + $0x8e0] sm:$0xf]  ;;  %v4369_v57 = vld [vmem:[#allocation2 + $0x6b4] sm:$0xf0]  ;;  %v3121_v61 = vor.u32 %v4228_v48, %v3118_v49 }
  0xe6   :  { %2188 = vmatpush.bf16.msra.mxu3 %v3501_v0  ;;  %v4198_v0 = vld [vmem:[#allocation2 + $0x164] sm:$0xf] }
  0xe7   :  { %2150 = vmatpush.bf16.msra.mxu0 %v2901_v54  ;;  %v3765_v54 = vor.u32 %v4393_v59, %v3764_v58  ;;  %v3860_v58 = vld [vmem:[#allocation2 + $0x820] sm:$0xf] }
  0xe8   :  { %2163 = vmatpush.bf16.msra.mxu1 %v3093_v10  ;;  %v3957_v10 = vor.u32 %v4441_v63, %v3956_v60  ;;  %v4174_v63 = vld [vmem:[#allocation2 + $0xa4] sm:$0xf] }
  0xe9   :  { %2176 = vmatpush.bf16.msra.mxu2 %v3285_v11  ;;  %v3001_v11 = vor.u32 %v4198_v0, %v2998_v1  ;;  %v2902_v0 = vld [vmem:[#allocation2 + $0xb8] sm:$0xf0]  ;;  %v4222_v1 = vld [vmem:[#allocation2 + $0x224] sm:$0xf] }
  0xea   :  { %2189 = vmatpush.bf16.msra.mxu3 %v3477_v16  ;;  %v3193_v16 = vor.u32 %v4246_v5, %v3190_v6  ;;  %v3669_v5 = vor.u32 %v4369_v57, %v3668_v55  ;;  %v4294_v55 = vld [vmem:[#allocation2 + $0x464] sm:$0xf]  ;;  %v3382_v57 = vld [vmem:[#allocation2 + $0x478] sm:$0xf0] }
  0xeb   :  { %2151 = vmatpush.bf16.msra.mxu0 %v2877_v27  ;;  %v4381_v27 = vld [vmem:[#allocation2 + $0x714] sm:$0xf0] }
  0xec   :  { %2164 = vmatpush.bf16.msra.mxu1 %v3069_v29  ;;  %v3169_v29 = vor.u32 %v4240_v20, %v3166_v21  ;;  %v3717_v38 = vor.u32 %v4381_v27, %v3716_v26  ;;  %v3070_v20 = vld [vmem:[#allocation2 + $0x208] sm:$0xf0]  ;;  %v3620_v27 = vld [vmem:[#allocation2 + $0x640] sm:$0xf] }
  0xed   :  { %2177 = vmatpush.bf16.msra.mxu2 %v3261_v30  ;;  %v4429_v30 = vld [vmem:[#allocation2 + $0x894] sm:$0xf0]  ;;  %v3073_v31 = vor.u32 %v4216_v19, %v3070_v20 }
  0xee   :  { %2190 = vmatpush.bf16.msra.mxu3 %v3453_v37  ;;  %v3142_v37 = vld [vmem:[#allocation2 + $0x298] sm:$0xf0]  ;;  %v3909_v39 = vor.u32 %v4429_v30, %v3908_v28  ;;  %v4357_v28 = vld [vmem:[#allocation2 + $0x654] sm:$0xf0] }
  0xef   :  { %2152 = vmatpush.bf16.msra.mxu0 %v2853_v43  ;;  %v3884_v43 = vld [vmem:[#allocation2 + $0x850] sm:$0xf]  ;;  %v3145_v44 = vor.u32 %v4234_v34, %v3142_v37  ;;  %v4162_v34 = vld [vmem:[#allocation2 + $0x44] sm:$0xf]  ;;  %v2854_v37 = vld [vmem:[#allocation2 + $0x58] sm:$0xf0] }
  0xf0   :  { %2165 = vmatpush.bf16.msra.mxu1 %v3045_v46  ;;  %v4180_v46 = vld [vmem:[#allocation2 + $0xd4] sm:$0xf]  ;;  %v3885_v52 = vor.u32 %v4423_v45, %v3884_v43  ;;  %v3788_v45 = vld [vmem:[#allocation2 + $0x790] sm:$0xf] }
  0xf1   :  { %2178 = vmatpush.bf16.msra.mxu2 %v3237_v47  ;;  %v2926_v47 = vld [vmem:[#allocation2 + $0xe8] sm:$0xf0] }
  0xf2   :  { %2191 = vmatpush.bf16.msra.mxu3 %v3429_v51  ;;  %v2929_v53 = vor.u32 %v4180_v46, %v2926_v47  ;;  %v4399_v46 = vld [vmem:[#allocation2 + $0x7a4] sm:$0xf0]  ;;  %v4156_v47 = vld [vmem:[#allocation2 + $0x14] sm:$0xf] }
  0xf3   :  { %2153 = vmatpush.bf16.msra.mxu0 %v2829_v62  ;;  %v1947_v51 = vpop.f32.mrf.mxu0  ;;  %v4417_v62 = vld [vmem:[#allocation2 + $0x834] sm:$0xf0] }
  0xf4   :  { %2166 = vmatpush.bf16.msra.mxu1 %v3021_v2  ;;  %v1948_v59 = vadd.f32 %v1947_v51, %v4759_v36  ;;  %v1960_v60 = vpop.f32.mrf.mxu1  ;;  %v3094_v2 = vld [vmem:[#allocation2 + $0x238] sm:$0xf0]  ;;  %v3861_v6 = vor.u32 %v4417_v62, %v3860_v58  ;;  %v4204_v51 = vld [vmem:[#allocation2 + $0x194] sm:$0xf]  ;;  %v4342_v58 = vld [vmem:[#allocation2 + $0x5e4] sm:$0xf] }
  0xf5   :  { %2179 = vmatpush.bf16.msra.mxu2 %v3213_v3  ;;  %v3097_v36 = vor.u32 %v4222_v1, %v3094_v2  ;;  %v3766_v62 = vld [vmem:[#allocation2 + $0x778] sm:$0xf0]  ;;  %v4438_v1 = vld [vmem:[#allocation2 + $0x8e4] sm:$0xf] }
  0xf6   :  { %2192 = vmatpush.bf16.msra.mxu3 %v3405_v7  ;;  %2154 = vmatmul.bf16.vlgmr.msra.gmra.mxu0 %v4704_v9  ;;  %v1961_v3 = vadd.f32 %v1960_v60, %v1948_v59  ;;  %v2905_v7 = vor.u32 %v4174_v63, %v2902_v0  ;;  %v3597_v59 = vor.u32 %v4351_v42, %v3596_v41  ;;  %v3574_v60 = vld [vmem:[#allocation2 + $0x5f8] sm:$0xf0]  ;;  %v3502_v42 = vld [vmem:[#allocation2 + $0x568] sm:$0xf0] }
  0xf7   :  { %2198 = vmatpush.bf16.msrb.mxu0 %v3765_v54  ;;  %2167 = vmatmul.bf16.vlgmr.msra.gmra.mxu1 %v4717_v25  ;;  %v3644_v54 = vld [vmem:[#allocation2 + $0x670] sm:$0xf]  ;;  %v3789_v63 = vor.u32 %v4399_v46, %v3788_v45  ;;  %v3958_v2 = vld [vmem:[#allocation2 + $0x8f8] sm:$0xf0]  ;;  %v4420_v45 = vld [vmem:[#allocation2 + $0x854] sm:$0xf] }
  0xf8   :  { %2211 = vmatpush.bf16.msrb.mxu1 %v3957_v10  ;;  %2180 = vmatmul.bf16.vlgmr.msra.gmra.mxu2 %v4702_v8  ;;  %v4363_v10 = vld [vmem:[#allocation2 + $0x684] sm:$0xf0] }
  0xf9   :  { %2224 = vmatpush.bf16.msrb.mxu2 %v3001_v11  ;;  %2193 = vmatmul.bf16.vlgmr.msra.gmra.mxu3 %v4709_v15  ;;  %v3836_v11 = vld [vmem:[#allocation2 + $0x7f0] sm:$0xf]  ;;  %v3645_v21 = vor.u32 %v4363_v10, %v3644_v54  ;;  %v4288_v54 = vld [vmem:[#allocation2 + $0x434] sm:$0xf]  ;;  %v3358_v10 = vld [vmem:[#allocation2 + $0x448] sm:$0xf0] }
  0xfa   :  { %2237 = vmatpush.bf16.msrb.mxu3 %v3193_v16  ;;  %v2878_v16 = vld [vmem:[#allocation2 + $0x88] sm:$0xf0] }
  0xfb   :  { %2199 = vmatpush.bf16.msrb.mxu0 %v3741_v22  ;;  %v1973_v12 = vpop.f32.mrf.mxu2  ;;  %v2881_v26 = vor.u32 %v4168_v14, %v2878_v16  ;;  %v3742_v14 = vld [vmem:[#allocation2 + $0x748] sm:$0xf0]  ;;  %v4432_v16 = vld [vmem:[#allocation2 + $0x8b4] sm:$0xf] }
  0xfc   :  { %2212 = vmatpush.bf16.msrb.mxu1 %v3933_v23  ;;  %v1974_v17 = vadd.f32 %v1973_v12, %v1961_v3  ;;  %v1986_v18 = vpop.f32.mrf.mxu3  ;;  %v1949_v23 = vpop.f32.mrf.mxu0  ;;  %v3961_v12 = vor.u32 %v4438_v1, %v3958_v2  ;;  %v3262_v1 = vld [vmem:[#allocation2 + $0x388] sm:$0xf0]  ;;  %v4312_v2 = vld [vmem:[#allocation2 + $0x4f4] sm:$0xf] }
  0xfd   :  { %2225 = vmatpush.bf16.msrb.mxu2 %v2977_v24  ;;  %v3837_v24 = vor.u32 %v4411_v13, %v3836_v11  ;;  %v1962_v30 = vpop.f32.mrf.mxu1  ;;  %v4336_v11 = vld [vmem:[#allocation2 + $0x5b4] sm:$0xf]  ;;  %v3334_v23 = vld [vmem:[#allocation2 + $0x418] sm:$0xf0] }
  0xfe   :  { %2238 = vmatpush.bf16.msrb.mxu3 %v3169_v29  ;;  %v4766_v22 = vadd.f32 %v1986_v18, %v1974_v17  ;;  %v3812_v29 = vld [vmem:[#allocation2 + $0x7c0] sm:$0xf]  ;;  %v4384_v13 = vld [vmem:[#allocation2 + $0x734] sm:$0xf]  ;;  %v3934_v17 = vld [vmem:[#allocation2 + $0x8c8] sm:$0xf0]  ;;  %v3361_v18 = vor.u32 %v4288_v54, %v3358_v10 }
  0xff   :  { %2200 = vmatpush.bf16.msrb.mxu0 %v3717_v38  ;;  %v4210_v38 = vld [vmem:[#allocation2 + $0x1c4] sm:$0xf]  ;;  %v3813_v43 = vor.u32 %v4405_v33, %v3812_v29  ;;  %v3745_v20 = vor.u32 %v4384_v13, %v3742_v14  ;;  %v3718_v29 = vld [vmem:[#allocation2 + $0x718] sm:$0xf0]  ;;  %v4408_v10 = vld [vmem:[#allocation2 + $0x7f4] sm:$0xf] }
 0x100   :  { %2213 = vmatpush.bf16.msrb.mxu1 %v3909_v39  ;;  %v3046_v39 = vld [vmem:[#allocation2 + $0x1d8] sm:$0xf0]  ;;  %v4426_v30 = vld [vmem:[#allocation2 + $0x884] sm:$0xf] }
 0x101   :  { %2226 = vmatpush.bf16.msrb.mxu2 %v2953_v40  ;;  %v3621_v40 = vor.u32 %v4357_v28, %v3620_v27  ;;  %v3049_v49 = vor.u32 %v4210_v38, %v3046_v39  ;;  %v3526_v27 = vld [vmem:[#allocation2 + $0x598] sm:$0xf0]  ;;  %v4378_v28 = vld [vmem:[#allocation2 + $0x704] sm:$0xf]  ;;  %v4276_v38 = vld [vmem:[#allocation2 + $0x3d4] sm:$0xf] }
 0x102   :  { %2239 = vmatpush.bf16.msrb.mxu3 %v3145_v44  ;;  %v2857_v44 = vor.u32 %v4162_v34, %v2854_v37  ;;  %v3721_v37 = vor.u32 %v4378_v28, %v3718_v29  ;;  %v3310_v39 = vld [vmem:[#allocation2 + $0x3e8] sm:$0xf0]  ;;  %v3814_v28 = vld [vmem:[#allocation2 + $0x7d8] sm:$0xf0] }
 0x103   :  { %2201 = vmatpush.bf16.msrb.mxu0 %v3693_v50  ;;  %v1975_v48 = vpop.f32.mrf.mxu2  ;;  %v2830_v50 = vld [vmem:[#allocation2 + $0x28] sm:$0xf0] }
 0x104   :  { %2214 = vmatpush.bf16.msrb.mxu1 %v3885_v52  ;;  %v3022_v52 = vld [vmem:[#allocation2 + $0x1a8] sm:$0xf0]  ;;  %v2833_v0 = vor.u32 %v4156_v47, %v2830_v50  ;;  %v3313_v47 = vor.u32 %v4276_v38, %v3310_v39  ;;  %v4270_v50 = vld [vmem:[#allocation2 + $0x3a4] sm:$0xf]  ;;  %v384_v38 = vperm.slane %v4746_v56, 2 }
 0x105   :  { %2227 = vmatpush.bf16.msrb.mxu2 %v2929_v53  ;;  %v1988_v53 = vpop.f32.mrf.mxu3  ;;  %v3025_v3 = vor.u32 %v4204_v51, %v3022_v52  ;;  %v3286_v51 = vld [vmem:[#allocation2 + $0x3b8] sm:$0xf0]  ;;  %v4318_v52 = vld [vmem:[#allocation2 + $0x524] sm:$0xf] }
 0x106   :  { %2240 = vmatpush.bf16.msrb.mxu3 %v3121_v61  ;;  %v4390_v61 = vld [vmem:[#allocation2 + $0x764] sm:$0xf] }
 0x107   :  { %2202 = vmatpush.bf16.msrb.mxu0 %v3669_v5  ;;  %v3385_v5 = vor.u32 %v4294_v55, %v3382_v57  ;;  %v3478_v55 = vld [vmem:[#allocation2 + $0x538] sm:$0xf0]  ;;  %v4366_v57 = vld [vmem:[#allocation2 + $0x6a4] sm:$0xf] }
 0x108   :  { %2215 = vmatpush.bf16.msrb.mxu1 %v3861_v6  ;;  %v3577_v6 = vor.u32 %v4342_v58, %v3574_v60  ;;  %v3670_v58 = vld [vmem:[#allocation2 + $0x6b8] sm:$0xf0] }
 0x109   :  { %2228 = vmatpush.bf16.msrb.mxu2 %v2905_v7  ;;  %v3769_v7 = vor.u32 %v4390_v61, %v3766_v62  ;;  %v3862_v60 = vld [vmem:[#allocation2 + $0x838] sm:$0xf0]  ;;  %v3289_v61 = vor.u32 %v4270_v50, %v3286_v51  ;;  %v3481_v62 = vor.u32 %v4318_v52, %v3478_v55 }
 0x10a   :  { %2241 = vmatpush.bf16.msrb.mxu3 %v3097_v36  ;;  %v3550_v36 = vld [vmem:[#allocation2 + $0x5c8] sm:$0xf0]  ;;  %v4449_v56 = vld [vmem:[#allocation7 + $0x38] sm:$0xff] }
 0x10b   :  { %2203 = vmatpush.bf16.msrb.mxu0 %v3645_v21  ;;  %v3553_v19 = vor.u32 %v4336_v11, %v3550_v36  ;;  %v4282_v21 = vld [vmem:[#allocation2 + $0x404] sm:$0xf]  ;;  %v3838_v11 = vld [vmem:[#allocation2 + $0x808] sm:$0xf0] }
 0x10c   :  { %2216 = vmatpush.bf16.msrb.mxu1 %v3837_v24  ;;  %v4330_v24 = vld [vmem:[#allocation2 + $0x584] sm:$0xf]  ;;  %v3337_v33 = vor.u32 %v4282_v21, %v3334_v23  ;;  %v3841_v21 = vor.u32 %v4408_v10, %v3838_v11  ;;  %v3430_v23 = vld [vmem:[#allocation2 + $0x4d8] sm:$0xf0] }
 0x10d   :  { %2229 = vmatpush.bf16.msrb.mxu2 %v2881_v26  ;;  %v3937_v26 = vor.u32 %v4432_v16, %v3934_v17  ;;  %v3529_v34 = vor.u32 %v4330_v24, %v3526_v27  ;;  %v4354_v24 = vld [vmem:[#allocation2 + $0x644] sm:$0xf] }
 0x10e   :  { %2242 = vmatpush.bf16.msrb.mxu3 %v3073_v31  ;;  %v3910_v31 = vld [vmem:[#allocation2 + $0x898] sm:$0xf0]  ;;  %v4402_v27 = vld [vmem:[#allocation2 + $0x7c4] sm:$0xf] }
 0x10f   :  { %2204 = vmatpush.bf16.msrb.mxu0 %v3621_v40  ;;  %v4324_v40 = vld [vmem:[#allocation2 + $0x554] sm:$0xf]  ;;  %v3913_v41 = vor.u32 %v4426_v30, %v3910_v31  ;;  %v3817_v39 = vor.u32 %v4402_v27, %v3814_v28  ;;  %v4457_v52 = vld [vmem:[#allocation7 + $0x78] sm:$0xff]  ;;  %v4442_v27 = vld [vmem:[#allocation7] sm:$0xff] }
 0x110   :  { %2217 = vmatpush.bf16.msrb.mxu1 %v3813_v43  ;;  %v4372_v43 = vld [vmem:[#allocation2 + $0x6d4] sm:$0xf] }
 0x111   :  { %2230 = vmatpush.bf16.msrb.mxu2 %v2857_v44  ;;  %v3694_v44 = vld [vmem:[#allocation2 + $0x6e8] sm:$0xf0]  ;;  %v4252_v30 = vld [vmem:[#allocation2 + $0x314] sm:$0xf] }
 0x112   :  { %2243 = vmatpush.bf16.msrb.mxu3 %v3049_v49  ;;  %v3697_v49 = vor.u32 %v4372_v43, %v3694_v44  ;;  %v4396_v44 = vld [vmem:[#allocation2 + $0x794] sm:$0xf] }
 0x113   :  { %2205 = vmatpush.bf16.msrb.mxu0 %v3597_v59  ;;  %v4772_v46 = vpop.f32.mrf.mxu0  ;;  %v4414_v59 = vld [vmem:[#allocation2 + $0x824] sm:$0xf]  ;;  %v4467_v28 = vld [vmem:[#allocation7 + $0xc8] sm:$0xff] }
 0x114   :  { %2218 = vmatpush.bf16.msrb.mxu1 %v3789_v63  ;;  %v4774_v48 = vpop.f32.mrf.mxu1  ;;  %v3673_v63 = vor.u32 %v4366_v57, %v3670_v58  ;;  %v2000_v50 = vadd.f32 %v4772_v46, %v384_v38  ;;  %v4448_v57 = vld [vmem:[#allocation7 + $0x30] sm:$0xff]  ;;  %v4473_v58 = vld [vmem:[#allocation7 + $0xf8] sm:$0xff] }
 0x115   :  { %2231 = vmatpush.bf16.msrb.mxu2 %v2833_v0  ;;  %v4264_v0 = vld [vmem:[#allocation2 + $0x374] sm:$0xf] }
 0x116   :  { %2244 = vmatpush.bf16.msrb.mxu3 %v3025_v3  ;;  %2206 = vmatmul.bf16.vlgmr.msrb.gmra.mxu0 %v4726_v32  ;;  %v3865_v3 = vor.u32 %v4414_v59, %v3862_v60  ;;  %v3265_v13 = vor.u32 %v4264_v0, %v3262_v1  ;;  %v2013_v55 = vadd.f32 %v4774_v48, %v2000_v50  ;;  %v4456_v59 = vld [vmem:[#allocation7 + $0x70] sm:$0xff]  ;;  %v4447_v48 = vld [vmem:[#allocation7 + $0x28] sm:$0xff] }
 0x117   :  { %2250 = vmatpush.bf16.msra.mxu0 %v3385_v5  ;;  %2219 = vmatmul.bf16.vlgmr.msrb.gmra.mxu1 %v4728_v35  ;;  %v3454_v5 = vld [vmem:[#allocation2 + $0x508] sm:$0xf0]  ;;  %v4464_v60 = vld [vmem:[#allocation7 + $0xb0] sm:$0xff] }
 0x118   :  { %2263 = vmatpush.bf16.msra.mxu1 %v3577_v6  ;;  %2232 = vmatmul.bf16.vlgmr.msrb.gmra.mxu2 %v4704_v9  ;;  %v3886_v9 = vld [vmem:[#allocation2 + $0x868] sm:$0xf0]  ;;  %v4360_v6 = vld [vmem:[#allocation2 + $0x674] sm:$0xf]  ;;  %v3457_v16 = vor.u32 %v4312_v2, %v3454_v5  ;;  %v4445_v5 = vld [vmem:[#allocation7 + $0x18] sm:$0xff] }
 0x119   :  { %2276 = vmatpush.bf16.msra.mxu2 %v3769_v7  ;;  %2245 = vmatmul.bf16.vlgmr.msrb.gmra.mxu3 %v4717_v25  ;;  %v3505_v25 = vor.u32 %v4324_v40, %v3502_v42  ;;  %v3889_v53 = vor.u32 %v4420_v45, %v3886_v9  ;;  %v3646_v7 = vld [vmem:[#allocation2 + $0x688] sm:$0xf0] }
 0x11a   :  { %2289 = vmatpush.bf16.msra.mxu3 %v3961_v12  ;;  %v3649_v17 = vor.u32 %v4360_v6, %v3646_v7  ;;  %v3406_v40 = vld [vmem:[#allocation2 + $0x4a8] sm:$0xf0]  ;;  %v4453_v7 = vld [vmem:[#allocation7 + $0x58] sm:$0xff] }
 0x11b   :  { %2251 = vmatpush.bf16.msra.mxu0 %v3361_v18  ;;  %v4776_v54 = vpop.f32.mrf.mxu2  ;;  %v2001_v12 = vpop.f32.mrf.mxu0  ;;  %v4258_v18 = vld [vmem:[#allocation2 + $0x344] sm:$0xf]  ;;  %v3598_v42 = vld [vmem:[#allocation2 + $0x628] sm:$0xf0] }
 0x11c   :  { %2264 = vmatpush.bf16.msra.mxu1 %v3553_v19  ;;  %v4778_v36 = vpop.f32.mrf.mxu3  ;;  %v2014_v14 = vpop.f32.mrf.mxu1  ;;  %v3238_v19 = vld [vmem:[#allocation2 + $0x358] sm:$0xf0]  ;;  %v3790_v45 = vld [vmem:[#allocation2 + $0x7a8] sm:$0xf0]  ;;  %v2026_v46 = vadd.f32 %v4776_v54, %v2013_v55 }
 0x11d   :  { %2277 = vmatpush.bf16.msra.mxu2 %v3745_v20  ;;  %v4306_v20 = vld [vmem:[#allocation2 + $0x4c4] sm:$0xf]  ;;  %v3241_v29 = vor.u32 %v4258_v18, %v3238_v19  ;;  %v3793_v51 = vor.u32 %v4396_v44, %v3790_v45  ;;  %v4460_v18 = vld [vmem:[#allocation7 + $0x90] sm:$0xff]  ;;  %v4443_v19 = vld [vmem:[#allocation7 + $0x8] sm:$0xff] }
 0x11e   :  { %2290 = vmatpush.bf16.msra.mxu3 %v3937_v26  ;;  %v3622_v26 = vld [vmem:[#allocation2 + $0x658] sm:$0xf0]  ;;  %v3433_v31 = vor.u32 %v4306_v20, %v3430_v23  ;;  %v2039_v0 = vadd.f32 %v4778_v36, %v2026_v46  ;;  %v4462_v2 = vld [vmem:[#allocation7 + $0xa0] sm:$0xff]  ;;  %v4459_v23 = vld [vmem:[#allocation7 + $0x88] sm:$0xff] }
 0x11f   :  { %2252 = vmatpush.bf16.msra.mxu0 %v3337_v33  ;;  %v3625_v33 = vor.u32 %v4354_v24, %v3622_v26  ;;  %v4470_v6 = vld [vmem:[#allocation7 + $0xe0] sm:$0xff]  ;;  %v4461_v54 = vld [vmem:[#allocation7 + $0x98] sm:$0xff]  ;;  %v4468_v20 = vld [vmem:[#allocation7 + $0xd0] sm:$0xff] }
 0x120   :  { %2265 = vmatpush.bf16.msra.mxu1 %v3529_v34  ;;  %v3214_v34 = vld [vmem:[#allocation2 + $0x328] sm:$0xf0]  ;;  %v4480_v45 = vld [vmem:[#allocation7 + $0x130] sm:$0xff] }
 0x121   :  { %2278 = vmatpush.bf16.msra.mxu2 %v3721_v37  ;;  %v4300_v37 = vld [vmem:[#allocation2 + $0x494] sm:$0xf] }
 0x122   :  { %2291 = vmatpush.bf16.msra.mxu3 %v3913_v41  ;;  %v4348_v41 = vld [vmem:[#allocation2 + $0x614] sm:$0xf] }
 0x123   :  { %2253 = vmatpush.bf16.msra.mxu0 %v3313_v47  ;;  %v2027_v43 = vpop.f32.mrf.mxu2  ;;  %v3217_v47 = vor.u32 %v4252_v30, %v3214_v34  ;;  %v4458_v30 = vld [vmem:[#allocation7 + $0x80] sm:$0xff] }
 0x124   :  { %2266 = vmatpush.bf16.msra.mxu1 %v3505_v25  ;;  %v2040_v9 = vpop.f32.mrf.mxu3  ;;  %v3409_v25 = vor.u32 %v4300_v37, %v3406_v40  ;;  %v4791_v37 = vld [vmem:[#allocation5] sm:$0x3f]  ;;  %v4466_v40 = vld [vmem:[#allocation7 + $0xc0] sm:$0xff] }
 0x125   :  { %2279 = vmatpush.bf16.msra.mxu2 %v3697_v49  ;;  %v3601_v49 = vor.u32 %v4348_v41, %v3598_v42 }
 0x126   :  { %2292 = vmatpush.bf16.msra.mxu3 %v3889_v53  ;;  %v4465_v53 = vld [vmem:[#allocation7 + $0xb8] sm:$0xff] }
 0x127   :  { %2254 = vmatpush.bf16.msra.mxu0 %v3289_v61  ;;  %v4472_v61 = vld [vmem:[#allocation7 + $0xf0] sm:$0xff] }
 0x128   :  { %2267 = vmatpush.bf16.msra.mxu1 %v3481_v62  ;;  %v4455_v62 = vld [vmem:[#allocation7 + $0x68] sm:$0xff] }
 0x129   :  { %2280 = vmatpush.bf16.msra.mxu2 %v3673_v63  ;;  %v4463_v63 = vld [vmem:[#allocation7 + $0xa8] sm:$0xff] }
 0x12a   :  { %2293 = vmatpush.bf16.msra.mxu3 %v3865_v3 }
 0x12b   :  { %2255 = vmatpush.bf16.msra.mxu0 %v3265_v13  ;;  %v4444_v13 = vld [vmem:[#allocation7 + $0x10] sm:$0xff] }
 0x12c   :  { %2268 = vmatpush.bf16.msra.mxu1 %v3457_v16  ;;  %v4469_v16 = vld [vmem:[#allocation7 + $0xd8] sm:$0xff] }
 0x12d   :  { %2281 = vmatpush.bf16.msra.mxu2 %v3649_v17  ;;  %v4452_v17 = vld [vmem:[#allocation7 + $0x50] sm:$0xff] }
 0x12e   :  { %2294 = vmatpush.bf16.msra.mxu3 %v3841_v21  ;;  %v4451_v21 = vld [vmem:[#allocation7 + $0x48] sm:$0xff] }
 0x12f   :  { %2256 = vmatpush.bf16.msra.mxu0 %v3241_v29 }
 0x130   :  { %2269 = vmatpush.bf16.msra.mxu1 %v3433_v31 }
 0x131   :  { %2282 = vmatpush.bf16.msra.mxu2 %v3625_v33  ;;  %v4481_v33 = vld [vmem:[#allocation7 + $0x138] sm:$0xff] }
 0x132   :  { %2295 = vmatpush.bf16.msra.mxu3 %v3817_v39 }
 0x133   :  { %2257 = vmatpush.bf16.msra.mxu0 %v3217_v47  ;;  %v2051_v1 = vpop.f32.mrf.mxu0 }
 0x134   :  { %2270 = vmatpush.bf16.msra.mxu1 %v3409_v25  ;;  %v2052_v3 = vadd.f32 %v2051_v1, %v2039_v0  ;;  %v4479_v25 = vld [vmem:[#allocation7 + $0x128] sm:$0xff] }
 0x135   :  { %2283 = vmatpush.bf16.msra.mxu2 %v3601_v49  ;;  %v4475_v0 = vld [vmem:[#allocation7 + $0x108] sm:$0xff] }
 0x136   :  { %2296 = vmatpush.bf16.msra.mxu3 %v3793_v51  ;;  %2258 = vmatmul.bf16.vlgmr.msra.gmra.mxu0 %v4702_v8  ;;  %v4446_v8 = vld [vmem:[#allocation7 + $0x20] sm:$0xff] }
 0x137   :  { %2702 = vmatpush.bf16.msrb.mxu0 %v4449_v56  ;;  %2271 = vmatmul.bf16.vlgmr.msra.gmra.mxu1 %v4709_v15  ;;  %v2064_v15 = vpop.f32.mrf.mxu1 }
 0x138   :  { %2715 = vmatpush.bf16.msrb.mxu1 %v4457_v52  ;;  %2284 = vmatmul.bf16.vlgmr.msra.gmra.mxu2 %v4726_v32  ;;  %v4471_v32 = vld [vmem:[#allocation7 + $0xe8] sm:$0xff]  ;;  %v2065_v11 = vadd.f32 %v2064_v15, %v2052_v3  ;;  %v4478_v52 = vld [vmem:[#allocation7 + $0x120] sm:$0xff]  ;;  %v4489_v3 = vld [vmem:[#allocation7 + $0x178] sm:$0xff] }
 0x139   :  { %2728 = vmatpush.bf16.msrb.mxu2 %v4465_v53  ;;  %2297 = vmatmul.bf16.vlgmr.msra.gmra.mxu3 %v4728_v35  ;;  %v4454_v35 = vld [vmem:[#allocation7 + $0x60] sm:$0xff] }
 0x13a   :  { %2741 = vmatpush.bf16.msrb.mxu3 %v4473_v58  ;;  %4500 = vtanh.f32 %v2065_v11  ;;  %v4477_v58 = vld [vmem:[#allocation7 + $0x118] sm:$0xff] }
 0x13b   :  { %2703 = vmatpush.bf16.msrb.mxu0 %v4448_v57  ;;  %v2077_v10 = vpop.f32.mrf.mxu2  ;;  %v2053_v36 = vpop.f32.mrf.mxu0  ;;  %4502 = vtanh.f32 %v4756_v4  ;;  %v4450_v4 = vld [vmem:[#allocation7 + $0x40] sm:$0xff] }
 0x13c   :  { %2716 = vmatpush.bf16.msrb.mxu1 %v4456_v59  ;;  %v2090_v12 = vpop.f32.mrf.mxu3  ;;  %4504 = vtanh.f32 %v4766_v22  ;;  %v385_v22 = vperm.slane %v4791_v37, 3 }
 0x13d   :  { %2729 = vmatpush.bf16.msrb.mxu2 %v4464_v60 }
 0x13e   :  { %2742 = vmatpush.bf16.msrb.mxu3 %v4472_v61  ;;  %v2078_v42 = vadd.f32 %v2077_v10, %v385_v22  ;;  %v4487_v10 = vld [vmem:[#allocation7 + $0x168] sm:$0xff] }
 0x13f   :  { %2704 = vmatpush.bf16.msrb.mxu0 %v4447_v48  ;;  %v2066_v14 = vpop.f32.mrf.mxu1 }
 0x140   :  { %2717 = vmatpush.bf16.msrb.mxu1 %v4455_v62  ;;  %v4501_v29 = vpop.eup %4500  ;;  %v2091_v43 = vadd.f32 %v2090_v12, %v2078_v42 }
 0x141   :  { %2730 = vmatpush.bf16.msrb.mxu2 %v4463_v63  ;;  %v4503_v31 = vpop.eup %4502  ;;  %v2310_v38 = vpack.c.bf16 %v4501_v29, %v4501_v29  ;;  %v4476_v63 = vld [vmem:[#allocation7 + $0x110] sm:$0xff] }
 0x142   :  { %2743 = vmatpush.bf16.msrb.mxu3 %v4471_v32  ;;  %v4505_v34 = vpop.eup %4504  ;;  %v2308_v39 = vpack.c.bf16 %v4503_v31, %v4503_v31 }
 0x143   :  { %2705 = vmatpush.bf16.msrb.mxu0 %v4446_v8  ;;  %v2079_v24 = vpop.f32.mrf.mxu2  ;;  %v2309_v41 = vpack.c.bf16 %v4505_v34, %v4505_v34 }
 0x144   :  { %2718 = vmatpush.bf16.msrb.mxu1 %v4454_v35  ;;  %v2092_v26 = vpop.f32.mrf.mxu3  ;;  %v4474_v35 = vld [vmem:[#allocation7 + $0x100] sm:$0xff] }
 0x145   :  { %2731 = vmatpush.bf16.msrb.mxu2 %v4462_v2  ;;  %v386_v2 = vperm.slane %v4791_v37, 4 }
 0x146   :  { %2744 = vmatpush.bf16.msrb.mxu3 %v4470_v6 }
 0x147   :  { %2706 = vmatpush.bf16.msrb.mxu0 %v4445_v5  ;;  %v4488_v5 = vld [vmem:[#allocation7 + $0x170] sm:$0xff] }
 0x148   :  { %2719 = vmatpush.bf16.msrb.mxu1 %v4453_v7 }
 0x149   :  { %2732 = vmatpush.bf16.msrb.mxu2 %v4461_v54 }
 0x14a   :  { %2745 = vmatpush.bf16.msrb.mxu3 %v4469_v16 }
 0x14b   :  { %2707 = vmatpush.bf16.msrb.mxu0 %v4444_v13  ;;  %v4486_v13 = vld [vmem:[#allocation7 + $0x160] sm:$0xff] }
 0x14c   :  { %2720 = vmatpush.bf16.msrb.mxu1 %v4452_v17 }
 0x14d   :  { %2733 = vmatpush.bf16.msrb.mxu2 %v4460_v18  ;;  %v4485_v18 = vld [vmem:[#allocation7 + $0x158] sm:$0xff] }
 0x14e   :  { %2746 = vmatpush.bf16.msrb.mxu3 %v4468_v20  ;;  %v4484_v20 = vld [vmem:[#allocation7 + $0x150] sm:$0xff] }
 0x14f   :  { %2708 = vmatpush.bf16.msrb.mxu0 %v4443_v19 }
 0x150   :  { %2721 = vmatpush.bf16.msrb.mxu1 %v4451_v21 }
 0x151   :  { %2734 = vmatpush.bf16.msrb.mxu2 %v4459_v23 }
 0x152   :  { %2747 = vmatpush.bf16.msrb.mxu3 %v4467_v28 }
 0x153   :  { %2709 = vmatpush.bf16.msrb.mxu0 %v4442_v27  ;;  %v2103_v44 = vpop.f32.mrf.mxu0  ;;  %v4483_v27 = vld [vmem:[#allocation7 + $0x148] sm:$0xff] }
 0x154   :  { %2722 = vmatpush.bf16.msrb.mxu1 %v4450_v4  ;;  %v2104_v9 = vadd.f32 %v2103_v44, %v2091_v43  ;;  %v2116_v47 = vpop.f32.mrf.mxu1  ;;  %v4482_v4 = vld [vmem:[#allocation7 + $0x140] sm:$0xff] }
 0x155   :  { %2735 = vmatpush.bf16.msrb.mxu2 %v4458_v30 }
 0x156   :  { %2710 = vmatmul.bf16.vlgmr.msrb.gmra.mxu0 %v2308_v39  ;;  %2748 = vmatpush.bf16.msrb.mxu3 %v4466_v40  ;;  %v2117_v49 = vadd.f32 %v2116_v47, %v2104_v9 }
 0x157   :  { %2754 = vmatpush.bf16.msra.mxu0 %v4481_v33  ;;  %2723 = vmatmul.bf16.vlgmr.msrb.gmra.mxu1 %v2309_v41  ;;  %v387_v33 = vperm.slane %v4791_v37, 5 }
 0x158   :  { %2736 = vmatmul.bf16.vlgmr.msrb.gmra.mxu2 %v2310_v38  ;;  %2767 = vmatpush.bf16.msra.mxu1 %v4489_v3 }
 0x15b   :  { %2755 = vmatpush.bf16.msra.mxu0 %v4480_v45  ;;  %v2129_v50 = vpop.f32.mrf.mxu2  ;;  %v2105_v55 = vpop.f32.mrf.mxu0 }
 0x15c   :  { %v2130_v51 = vadd.f32 %v2129_v50, %v2117_v49  ;;  %v2142_v56 = vpop.f32.mrf.mxu3  ;;  %v2118_v57 = vpop.f32.mrf.mxu1  ;;  %2768 = vmatpush.bf16.msra.mxu1 %v4488_v5 }
 0x15e   :  { %v2143_v53 = vadd.f32 %v2142_v56, %v2130_v51  ;;  %v4499_v56 = vld [vmem:[#allocation8] ss:$0 sm:$0xff] }
 0x15f   :  { %2756 = vmatpush.bf16.msra.mxu0 %v4479_v25 }
 0x160   :  { %4506 = vtanh.f32 %v2143_v53  ;;  %2769 = vmatpush.bf16.msra.mxu1 %v4487_v10 }
 0x163   :  { %2757 = vmatpush.bf16.msra.mxu0 %v4478_v52  ;;  %v2131_v59 = vpop.f32.mrf.mxu2 }
 0x164   :  { %v2144_v60 = vpop.f32.mrf.mxu3  ;;  %2770 = vmatpush.bf16.msra.mxu1 %v4486_v13 }
 0x166   :  { %v4507_v46 = vpop.eup %4506 }
 0x167   :  { %2758 = vmatpush.bf16.msra.mxu0 %v4477_v58  ;;  %v2311_v48 = vpack.c.bf16 %v4507_v46, %v4507_v46 }
 0x168   :  { %2771 = vmatpush.bf16.msra.mxu1 %v4485_v18 }
 0x169   :  { %2749 = vmatmul.bf16.vlgmr.msrb.gmra.mxu3 %v2311_v48 }
 0x16b   :  { %2759 = vmatpush.bf16.msra.mxu0 %v4476_v63 }
 0x16c   :  { %2772 = vmatpush.bf16.msra.mxu1 %v4484_v20 }
 0x16f   :  { %2760 = vmatpush.bf16.msra.mxu0 %v4475_v0 }
 0x170   :  { %2773 = vmatpush.bf16.msra.mxu1 %v4483_v27 }
 0x173   :  { %v2155_v61 = vpop.f32.mrf.mxu0  ;;  %2761 = vmatpush.bf16.msra.mxu0 %v4474_v35 }
 0x174   :  { %v2168_v62 = vpop.f32.mrf.mxu1  ;;  %v2156_v6 = vadd.f32 %v2155_v61, %v386_v2  ;;  %2774 = vmatpush.bf16.msra.mxu1 %v4482_v4 }
 0x176   :  { %v2169_v11 = vadd.f32 %v2168_v62, %v2156_v6 }
 0x17b   :  { %v2181_v1 = vpop.f32.mrf.mxu2  ;;  %v2157_v8 = vpop.f32.mrf.mxu0 }
 0x17c   :  { %v2194_v15 = vpop.f32.mrf.mxu3  ;;  %v2170_v32 = vpop.f32.mrf.mxu1  ;;  %v2182_v12 = vadd.f32 %v2181_v1, %v2169_v11 }
 0x17e   :  { %v2195_v36 = vadd.f32 %v2194_v15, %v2182_v12 }
 0x183   :  { %v2183_v7 = vpop.f32.mrf.mxu2 }
 0x184   :  { %v2196_v54 = vpop.f32.mrf.mxu3 }
 0x193   :  { %v2207_v14 = vpop.f32.mrf.mxu0 }
 0x194   :  { %v2208_v16 = vadd.f32 %v2207_v14, %v2195_v36  ;;  %v2220_v17 = vpop.f32.mrf.mxu1 }
 0x196   :  { %v2221_v19 = vadd.f32 %v2220_v17, %v2208_v16 }
 0x198   :  { %4508 = vtanh.f32 %v2221_v19 }
 0x19b   :  { %v2233_v21 = vpop.f32.mrf.mxu2  ;;  %v2209_v24 = vpop.f32.mrf.mxu0 }
 0x19c   :  { %v2246_v23 = vpop.f32.mrf.mxu3  ;;  %v2222_v26 = vpop.f32.mrf.mxu1  ;;  %v2234_v34 = vadd.f32 %v2233_v21, %v387_v33 }
 0x19e   :  { %v4509_v28 = vpop.eup %4508  ;;  %v2247_v22 = vadd.f32 %v2246_v23, %v2234_v34 }
 0x19f   :  { %v2312_v29 = vpack.c.bf16 %v4509_v28, %v4509_v28 }
 0x1a1   :  { %2762 = vmatmul.bf16.vlgmr.msra.gmra.mxu0 %v2312_v29 }
 0x1a3   :  { %v2235_v30 = vpop.f32.mrf.mxu2 }
 0x1a4   :  { %v2248_v31 = vpop.f32.mrf.mxu3 }
 0x1b3   :  { %v2259_v38 = vpop.f32.mrf.mxu0 }
 0x1b4   :  { %v2272_v39 = vpop.f32.mrf.mxu1  ;;  %v2260_v40 = vadd.f32 %v2259_v38, %v2247_v22 }
 0x1b6   :  { %v2273_v41 = vadd.f32 %v2272_v39, %v2260_v40 }
 0x1bb   :  { %v2285_v42 = vpop.f32.mrf.mxu2  ;;  %v2261_v45 = vpop.f32.mrf.mxu0 }
 0x1bc   :  { %v2298_v43 = vpop.f32.mrf.mxu3  ;;  %v2286_v44 = vadd.f32 %v2285_v42, %v2273_v41  ;;  %v2274_v9 = vpop.f32.mrf.mxu1 }
 0x1be   :  { %v2299_v47 = vadd.f32 %v2298_v43, %v2286_v44 }
 0x1c0   :  { %4510 = vtanh.f32 %v2299_v47 }
 0x1c3   :  { %v2287_v25 = vpop.f32.mrf.mxu2 }
 0x1c4   :  { %v2300_v49 = vpop.f32.mrf.mxu3 }
 0x1c6   :  { %v4511_v50 = vpop.eup %4510 }
 0x1c7   :  { %v2313_v51 = vpack.c.bf16 %v4511_v50, %v4511_v50 }
 0x1c9   :  { %2775 = vmatmul.bf16.vlgmr.msra.gmra.mxu1 %v2313_v51 }
 0x1d3   :  { %v2711_v37 = vpop.f32.mrf.mxu0 }
 0x1d4   :  { %v2712_v52 = vadd.f32 %v4499_v56, %v2711_v37  ;;  %v2724_v53 = vpop.f32.mrf.mxu1 }
 0x1d6   :  { %v2725_v55 = vadd.f32 %v2724_v53, %v2712_v52 }
 0x1db   :  { %v2737_v57 = vpop.f32.mrf.mxu2  ;;  %v2713_v59 = vpop.f32.mrf.mxu0 }
 0x1dc   :  { %v2738_v58 = vadd.f32 %v2737_v57, %v2725_v55  ;;  %v2726_v60 = vpop.f32.mrf.mxu1 }
 0x1e3   :  { %v2739_v46 = vpop.f32.mrf.mxu2 }
 0x1ec   :  { %v2750_v48 = vpop.f32.mrf.mxu3 }
 0x1ed   :  { %v2751_v61 = vadd.f32 %v2750_v48, %v2738_v58 }
 0x1f4   :  { %v2752_v62 = vpop.f32.mrf.mxu3 }
 0x21e   :  { %v2763_v63 = vpop.f32.mrf.mxu0 }
 0x21f   :  { %v2764_v1 = vadd.f32 %v2763_v63, %v2751_v61 }
 0x226   :  { %v2765_v0 = vpop.f32.mrf.mxu0 }
 0x246   :  { %v2776_v8 = vpop.f32.mrf.mxu1 }
 0x247   :  { %v2777_v15 = vadd.f32 %v2776_v8, %v2764_v1 }
 0x249   :  { %2780 = vmax.xlane.f32.xlu0 %v2777_v15 }
 0x24e   :  { %v2778_v32 = vpop.f32.mrf.mxu1 }
 0x2bc   :  { %v2781_v35 = vpop.xlane.xlu0 %2780 }
 0x2bd   :  { %v2782_v2 = vsub.f32 %v2777_v15, %v2781_v35 }
 0x2bf   :  { %v2783_v3 = vmul.f32 1.442695, %v2782_v2 }
 0x2c1   :  { %4512 = vpow2.f32 %v2783_v3 }
 0x2c7   :  { %v4513_v5 = vpop.eup %4512 }
 0x2c8   :  { %2785 = vadd.xlane.f32.xlu0 %v4513_v5 }
 0x33b   :  { %v2786_v6 = vpop.xlane.xlu0 %2785 }
 0x33c   :  { %4514 = vlog2.f32 %v2786_v6 }
 0x342   :  { %v4515_v7 = vpop.eup %4514 }
 0x343   :  { %v2788_v54 = vmul.f32 0.6931472, %v4515_v7 }
 0x345   :  { %v2789_v10 = vsub.f32 %v2782_v2, %v2788_v54 }
 0x347   :  { %2790 = vst [vmem:[#allocation10] sm:$0xff] %v2789_v10 }
 0x348   :  { %2801 = dma.vmem_to_hbm [thread:$0]  %s2797_s25, 128, %s2799_s28, [#allocation4]  }
 0x349   :  { %4643 = dma.done.wait [#allocation4], 128  }
 0x34a   :  { %4644 = vsyncadd [#allocation4], 4294967168 }
 0x34b   :  { %2806 = vsyncpa [#allocation3], 1 }
 0x34c   :  { %2807 = vsyncpa [#allocation6], 1 }
 0x34d   :  { %2808 = vsyncpa [#allocation9], 1 }
 0x34e   :  { %2809 = vsyncpa [#allocation4], 1 }

</bundles_post_ra>
